<compile_context>
chip_gen: v7x
topology: tpu7x:2x2x1
jax: 0.10.0
libtpu: 0.0.40
codegen_flags: <defaults>
</compile_context>

<pallas_src>
import jax
import jax.numpy as jnp
from jax.experimental import pallas as pl
from jax.experimental.pallas import tpu as pltpu


# ------------------------- Pallas kernels -------------------------

def _bnorm_kernel(x_ref, gamma_ref, beta_ref, o_ref):
    # x_ref: (B, C, H*W).  Training-mode batch stats per channel, biased var,
    # eps=1e-5 (matches nn.BatchNorm2d forward in training mode, fresh module).
    # TODO(synk): eval-mode running statistics are not implemented.
    x = x_ref[...]
    cnt = x.shape[0] * x.shape[2]
    s = jnp.sum(x, axis=2, keepdims=True)          # lane reduce  -> (B, C, 1)
    mean = jnp.sum(s, axis=0, keepdims=True) / cnt  # batch reduce -> (1, C, 1)
    d = x - mean
    s2 = jnp.sum(d * d, axis=2, keepdims=True)
    var = jnp.sum(s2, axis=0, keepdims=True) / cnt  # two-pass: no cancellation
    inv = jax.lax.rsqrt(var + 1e-5)
    o_ref[...] = d * inv * gamma_ref[...] + beta_ref[...]


def batchnorm2d(x, gamma, beta):
    B, C, H, W = x.shape
    # (B, C, H*W) is a free view of NCHW -> no transposes around the kernel.
    x2 = x.reshape(B, C, H * W).astype(jnp.float32)
    g = gamma.reshape(1, C, 1).astype(jnp.float32)
    b = beta.reshape(1, C, 1).astype(jnp.float32)
    y = pl.pallas_call(
        _bnorm_kernel,
        out_shape=jax.ShapeDtypeStruct((B, C, H * W), jnp.float32),
        grid=(1,),
        in_specs=[
            pl.BlockSpec((B, C, H * W), lambda i: (0, 0, 0)),
            pl.BlockSpec((1, C, 1), lambda i: (0, 0, 0)),
            pl.BlockSpec((1, C, 1), lambda i: (0, 0, 0)),
        ],
        out_specs=pl.BlockSpec((B, C, H * W), lambda i: (0, 0, 0)),
    )(x2, g, b)
    return y.reshape(B, C, H, W)


def _modulus_kernel(re_ref, im_ref, o_ref):
    re = re_ref[...]
    im = im_ref[...]
    o_ref[...] = jnp.sqrt(re * re + im * im)


def complex_modulus(z):
    """|z| for a complex64 array: one batched, lane-dense Pallas launch per
    scattering order (2 launches total per forward)."""
    shape = z.shape
    n = z.size
    lanes = 128
    if n % lanes != 0:  # not hit for the shapes used in this model
        return jnp.abs(z)
    rows = n // lanes
    # TODO(synk): re/im deinterleave is one fused XLA pass over the complex
    # stack (<=1.5 MB); an in-kernel strided deinterleave of the bitcast slab
    # would save it but lane-strided loads are not relied on here.
    re = jnp.real(z).astype(jnp.float32).reshape(rows, lanes)
    im = jnp.imag(z).astype(jnp.float32).reshape(rows, lanes)
    # Fixed row tile + cdiv grid: keeps DMA/compute overlap and shards across
    # both TensorCores on v7x; stays within VMEM even if B / N grow.
    tile_rows = 256
    if rows <= tile_rows or rows % 8 != 0:
        tile, grid_n = rows, 1
    else:
        tile, grid_n = tile_rows, pl.cdiv(rows, tile_rows)
    out = pl.pallas_call(
        _modulus_kernel,
        out_shape=jax.ShapeDtypeStruct((rows, lanes), jnp.float32),
        grid=(grid_n,),
        in_specs=[
            pl.BlockSpec((tile, lanes), lambda i: (i, 0)),
            pl.BlockSpec((tile, lanes), lambda i: (i, 0)),
        ],
        out_specs=pl.BlockSpec((tile, lanes), lambda i: (i, 0)),
        compiler_params=pltpu.CompilerParams(dimension_semantics=("parallel",)),
    )(re, im)
    return out.reshape(shape)


def _project_kernel(u_ref, lt_ref, o_ref):
    # u: (rows, N*N), lt: (nspace^2, N*N)  ->  (rows, nspace^2)
    # contract dim 1 of both operands (weight kept long-axis-on-lanes).
    o_ref[...] = jax.lax.dot_general(
        u_ref[...], lt_ref[...],
        dimension_numbers=(((1,), (1,)), ((), ())),
        preferred_element_type=jnp.float32)


def lowpass_project(u, lt):
    R, K = u.shape
    P = lt.shape[0]
    # Total VMEM ~0.8 MiB -> single block, no pipelining needed.
    return pl.pallas_call(
        _project_kernel,
        out_shape=jax.ShapeDtypeStruct((R, P), jnp.float32),
        grid=(1,),
        in_specs=[
            pl.BlockSpec((R, K), lambda i: (0, 0)),
            pl.BlockSpec((P, K), lambda i: (0, 0)),
        ],
        out_specs=pl.BlockSpec((R, P), lambda i: (0, 0)),
    )(u.astype(jnp.float32), lt.astype(jnp.float32))


def _classifier_kernel(x_ref, wt_ref, b_ref, o_ref):
    # x: (B, K), wt: (Nout, K) (PyTorch layout -> no lane-padding blowup).
    o_ref[...] = (
        jax.lax.dot_general(
            x_ref[...], wt_ref[...],
            dimension_numbers=(((1,), (1,)), ((), ())),
            preferred_element_type=jnp.float32)
        + b_ref[...]
    )


def linear_classifier(x, wt, b):
    B, K = x.shape
    Nout = wt.shape[0]
    # Weight block is (Nout, K) = (10, 3888): sublane pad 10->16 only (~250 KiB),
    # well under the default scoped VMEM limit on v5e/v6e/v7x.
    return pl.pallas_call(
        _classifier_kernel,
        out_shape=jax.ShapeDtypeStruct((B, Nout), jnp.float32),
        grid=(1,),
        in_specs=[
            pl.BlockSpec((B, K), lambda i: (0, 0)),
            pl.BlockSpec((Nout, K), lambda i: (0, 0)),
            pl.BlockSpec((1, Nout), lambda i: (0, 0)),
        ],
        out_specs=pl.BlockSpec((B, Nout), lambda i: (0, 0)),
    )(x.astype(jnp.float32), wt.astype(jnp.float32),
      b.reshape(1, Nout).astype(jnp.float32))


# --------------------- Scattering transform (glue) ---------------------
# TODO(synk): fft2/ifft2 have no Pallas primitive; they remain as a few large
# *batched* XLA FFT ops (one per scattering order) feeding the Pallas modulus.

def make_morlet_filters(N, J, L, sigma0=0.8, xi0=3.0 * jnp.pi / 4.0):
    # Synthetic Morlet-style bank on an NxN periodic Fourier grid (real-valued
    # in the Fourier domain).
    # TODO(synk): no zero-mean correction / exact Kymatio normalization.
    omega = 2.0 * jnp.pi * jnp.fft.fftfreq(N)
    wy, wx = jnp.meshgrid(omega, omega, indexing="ij")
    phi = jnp.exp(-0.5 * (wx ** 2 + wy ** 2) * (sigma0 * (2.0 ** J)) ** 2)
    psi = []
    for j in range(J):
        s = sigma0 * (2.0 ** j)
        for t in range(L):
            theta = jnp.pi * t / L
            xi_x = (xi0 / (2.0 ** j)) * jnp.cos(theta)
            xi_y = (xi0 / (2.0 ** j)) * jnp.sin(theta)
            psi.append(jnp.exp(-0.5 * ((wx - xi_x) ** 2 + (wy - xi_y) ** 2) * s ** 2))
    psi = jnp.stack(psi).reshape(J, L, N, N).astype(jnp.float32)
    return phi.astype(jnp.float32), psi


def build_lowpass_matrix(N, J, phi_hat):
    """Linear map (N*N -> (N/2^J)^2): fft2 -> *phi -> Fourier periodization
    (subsample_fourier semantics) -> ifft2 -> real.  Precomputed once at init;
    applied per scattering branch by a small Pallas MXU matmul (kept factored
    instead of folded into the classifier weight)."""
    sub = 2 ** J
    Nk = N // sub
    eye = jnp.eye(N * N, dtype=jnp.float32).reshape(N * N, N, N)
    Ef = jnp.fft.fft2(eye) * phi_hat[None]
    Ef = Ef.reshape(N * N, sub, Nk, sub, Nk).mean(axis=(1, 3))   # periodize
    Ls = jnp.real(jnp.fft.ifft2(Ef))                             # (N*N, Nk, Nk)
    return Ls.reshape(N * N, Nk * Nk).astype(jnp.float32)        # out = u @ Ls


# --------------------------- Model ---------------------------

class AlexScatFNumN2Res:
    def __init__(self, num_classes=10, n=16, j=2, l=8, extra_conv=0, key=None):
        # TODO(synk): extra_conv > 0 (residual conv branch) not implemented;
        # the reference module defaults to extra_conv=0.
        assert extra_conv == 0, "reference module default (extra_conv=0) path implemented"
        self.J, self.N, self.L = j, n, l
        self.nfscat = int(1 + l * j + (l * l * j * (j - 1)) // 2)   # 81 for j=2, l=8
        self.nspace = n // (2 ** j)
        in_features = self.nfscat * 3 * self.nspace * self.nspace   # 3888
        key = jax.random.PRNGKey(0) if key is None else key
        kw, kb = jax.random.split(key)
        bound = 1.0 / float(jnp.sqrt(in_features))
        # classifier = nn.Linear(nfscat*3*nspace*nspace, num_classes).
        # Weight kept in the PyTorch (out, in) layout so the in_features axis
        # (3888) is the lane axis -> no VMEM/HBM padding blowup.
        self.Wt = jax.random.uniform(kw, (num_classes, in_features), jnp.float32, -bound, bound)
        self.b = jax.random.uniform(kb, (num_classes,), jnp.float32, -bound, bound)
        # bnorm = nn.BatchNorm2d(3): weight=1, bias=0
        self.gamma = jnp.ones((3,), jnp.float32)
        self.beta = jnp.zeros((3,), jnp.float32)
        self.phi_hat, self.psi_hat = make_morlet_filters(n, j, l)
        # Low-pass projection matrix, stored transposed ((nspace^2, N*N)) so its
        # long axis is also the lane axis.
        self.Lt = build_lowpass_matrix(n, j, self.phi_hat).T        # (16, 256)
        self.remove = None

    def scattering_U(self, x):
        """Pre-low-pass scattering stack U: (B, 3, nfscat, N, N) real.
        Branch order: [order0 (x itself)] + [order1 (j1,t1)] + [order2]."""
        B, C, N, _ = x.shape
        J, L = self.J, self.L
        Xf = jnp.fft.fft2(x)                                           # (B,C,N,N)
        # ---- order 1: all J*L wavelets batched, one Pallas modulus call
        psi = self.psi_hat.reshape(J * L, N, N)
        U1 = complex_modulus(jnp.fft.ifft2(Xf[:, :, None] * psi[None, None]))  # (B,C,J*L,N,N)
        parts = [x[:, :, None], U1]
        # ---- order 2 (j2 > j1): all products batched, one Pallas modulus call
        if J > 1:
            U1f = jnp.fft.fft2(U1[:, :, : (J - 1) * L])                # only j1 < J-1 needed
            prods = []
            for j1 in range(J - 1):
                for j2 in range(j1 + 1, J):
                    p = (U1f[:, :, j1 * L:(j1 + 1) * L, None]
                         * self.psi_hat[j2][None, None, None])         # (B,C,L,L,N,N)
                    prods.append(p.reshape(B, C, L * L, N, N))
            # Skip the concatenate for the single-pair (J=2) case.
            Z2 = prods[0] if len(prods) == 1 else jnp.concatenate(prods, axis=2)
            U2 = complex_modulus(jnp.fft.ifft2(Z2))
            parts.append(U2)
        return jnp.concatenate(parts, axis=2)                          # (B,C,nfscat,N,N)

    def __call__(self, x):
        B = x.shape[0]
        N = self.N
        x = batchnorm2d(x, self.gamma, self.beta)                      # Pallas kernel
        U = self.scattering_U(x)                                       # 2 Pallas modulus calls
        if self.remove is not None:
            U = U.reshape(B, 3 * self.nfscat, N * N)
            U = U.at[:, self.remove, :].set(0.0)
            U = U.reshape(B, 3, self.nfscat, N, N)
        # Factored low-pass + subsample: (B*3*81, 256) @ (256, 16) Pallas matmul.
        Uf = U.reshape(B * 3 * self.nfscat, N * N)
        S = lowpass_project(Uf, self.Lt)                               # (B*3*81, 16)
        feats = S.reshape(B, 3 * self.nfscat * self.nspace * self.nspace)  # (B, 3888)
        # Original nn.Linear as a single small Pallas MXU matmul.
        return linear_classifier(feats, self.Wt, self.b)


if __name__ == "__main__":
    key = jax.random.PRNGKey(0)
    kx, kp = jax.random.split(key)
    B, C, N = 2, 3, 16
    x = jax.random.normal(kx, (B, C, N, N), dtype=jnp.float32)
    model = AlexScatFNumN2Res(num_classes=10, n=N, j=2, l=8, extra_conv=0, key=kp)
    fwd = jax.jit(model.__call__)
    out = fwd(x)
    jax.block_until_ready(out)
    assert out.shape == (B, 10) and out.dtype == jnp.float32
    print("KERNEL_OK")
</pallas_src>

<mosaic_0001>
module attributes {stable_mosaic.version = 11 : i64} {
  func.func @_bnorm_kernel(%arg0: i32, %arg1: memref<2x3x256xf32, #tpu.memory_space<vmem>>, %arg2: memref<1x3x1xf32, #tpu.memory_space<vmem>>, %arg3: memref<1x3x1xf32, #tpu.memory_space<vmem>>, %arg4: memref<2x3x256xf32, #tpu.memory_space<vmem>>) attributes {dimension_semantics = [#tpu.dimension_semantics<arbitrary>], iteration_bounds = array<i64: 1>, scalar_prefetch = 0 : i64, scratch_operands = 0 : i64, tpu.core_type = #tpu.core_type<tc>, window_params = [{pipeline_mode = #tpu.pipeline_mode<synchronous>, transform_indices = @transform_0, window_bounds = array<i64: 2, 3, 256>}, {pipeline_mode = #tpu.pipeline_mode<synchronous>, transform_indices = @transform_1, window_bounds = array<i64: 1, 3, 1>}, {pipeline_mode = #tpu.pipeline_mode<synchronous>, transform_indices = @transform_2, window_bounds = array<i64: 1, 3, 1>}, {pipeline_mode = #tpu.pipeline_mode<synchronous>, transform_indices = @transform_3, window_bounds = array<i64: 2, 3, 256>}]} {
    %c0 = arith.constant 0 : index
    %c0_0 = arith.constant 0 : index
    %c0_1 = arith.constant 0 : index
    %0 = vector.load %arg1[%c0, %c0_0, %c0_1] : memref<2x3x256xf32, #tpu.memory_space<vmem>>, vector<2x3x256xf32>
    %cst = arith.constant dense<0.000000e+00> : vector<2x3xf32>
    %1 = vector.multi_reduction <add>, %0, %cst [2] : vector<2x3x256xf32> to vector<2x3xf32>
    %2 = vector.shape_cast %1 : vector<2x3xf32> to vector<2x3x1xf32>
    %cst_2 = arith.constant dense<0.000000e+00> : vector<3x1xf32>
    %3 = vector.multi_reduction <add>, %2, %cst_2 [0] : vector<2x3x1xf32> to vector<3x1xf32>
    %4 = vector.shape_cast %3 : vector<3x1xf32> to vector<1x3x1xf32>
    %cst_3 = arith.constant 5.120000e+02 : f32
    %5 = vector.broadcast %cst_3 : f32 to vector<1x3x1xf32>
    %6 = arith.divf %4, %5 : vector<1x3x1xf32>
    %7 = vector.broadcast %6 : vector<1x3x1xf32> to vector<2x3x256xf32>
    %8 = arith.subf %0, %7 : vector<2x3x256xf32>
    %9 = arith.mulf %8, %8 : vector<2x3x256xf32>
    %cst_4 = arith.constant dense<0.000000e+00> : vector<2x3xf32>
    %10 = vector.multi_reduction <add>, %9, %cst_4 [2] : vector<2x3x256xf32> to vector<2x3xf32>
    %11 = vector.shape_cast %10 : vector<2x3xf32> to vector<2x3x1xf32>
    %cst_5 = arith.constant dense<0.000000e+00> : vector<3x1xf32>
    %12 = vector.multi_reduction <add>, %11, %cst_5 [0] : vector<2x3x1xf32> to vector<3x1xf32>
    %13 = vector.shape_cast %12 : vector<3x1xf32> to vector<1x3x1xf32>
    %cst_6 = arith.constant 5.120000e+02 : f32
    %14 = vector.broadcast %cst_6 : f32 to vector<1x3x1xf32>
    %15 = arith.divf %13, %14 : vector<1x3x1xf32>
    %cst_7 = arith.constant 9.99999974E-6 : f32
    %16 = vector.broadcast %cst_7 : f32 to vector<1x3x1xf32>
    %17 = arith.addf %15, %16 : vector<1x3x1xf32>
    %18 = math.rsqrt %17 : vector<1x3x1xf32>
    %19 = vector.broadcast %18 : vector<1x3x1xf32> to vector<2x3x256xf32>
    %20 = arith.mulf %8, %19 : vector<2x3x256xf32>
    %c0_8 = arith.constant 0 : index
    %c0_9 = arith.constant 0 : index
    %c0_10 = arith.constant 0 : index
    %21 = vector.load %arg2[%c0_8, %c0_9, %c0_10] : memref<1x3x1xf32, #tpu.memory_space<vmem>>, vector<1x3x1xf32>
    %22 = vector.broadcast %21 : vector<1x3x1xf32> to vector<2x3x256xf32>
    %23 = arith.mulf %20, %22 : vector<2x3x256xf32>
    %c0_11 = arith.constant 0 : index
    %c0_12 = arith.constant 0 : index
    %c0_13 = arith.constant 0 : index
    %24 = vector.load %arg3[%c0_11, %c0_12, %c0_13] : memref<1x3x1xf32, #tpu.memory_space<vmem>>, vector<1x3x1xf32>
    %25 = vector.broadcast %24 : vector<1x3x1xf32> to vector<2x3x256xf32>
    %26 = arith.addf %23, %25 : vector<2x3x256xf32>
    %c0_14 = arith.constant 0 : index
    %c0_15 = arith.constant 0 : index
    %c0_16 = arith.constant 0 : index
    %27 = vector.load %arg4[%c0_14, %c0_15, %c0_16] : memref<2x3x256xf32, #tpu.memory_space<vmem>>, vector<2x3x256xf32>
    tpu.vector_store %arg4[%c0_14, %c0_15, %c0_16], %26 {strides = array<i32>} : memref<2x3x256xf32, #tpu.memory_space<vmem>>, vector<2x3x256xf32>,
    return
  }
  func.func @transform_0(%arg0: i32) -> (i32, i32, i32) {
    %c0_i32 = arith.constant 0 : i32
    %c0_i32_0 = arith.constant 0 : i32
    %c0_i32_1 = arith.constant 0 : i32
    %c0_i32_2 = arith.constant 0 : i32
    return %c0_i32, %c0_i32_0, %c0_i32_1 : i32, i32, i32
  }
  func.func @transform_1(%arg0: i32) -> (i32, i32, i32) {
    %c0_i32 = arith.constant 0 : i32
    %c0_i32_0 = arith.constant 0 : i32
    %c0_i32_1 = arith.constant 0 : i32
    %c0_i32_2 = arith.constant 0 : i32
    return %c0_i32, %c0_i32_0, %c0_i32_1 : i32, i32, i32
  }
  func.func @transform_2(%arg0: i32) -> (i32, i32, i32) {
    %c0_i32 = arith.constant 0 : i32
    %c0_i32_0 = arith.constant 0 : i32
    %c0_i32_1 = arith.constant 0 : i32
    %c0_i32_2 = arith.constant 0 : i32
    return %c0_i32, %c0_i32_0, %c0_i32_1 : i32, i32, i32
  }
  func.func @transform_3(%arg0: i32) -> (i32, i32, i32) {
    %c0_i32 = arith.constant 0 : i32
    %c0_i32_0 = arith.constant 0 : i32
    %c0_i32_1 = arith.constant 0 : i32
    %c0_i32_2 = arith.constant 0 : i32
    return %c0_i32, %c0_i32_0, %c0_i32_1 : i32, i32, i32
  }
}

module attributes {stable_mosaic.version = 11 : i64} {
  func.func @_modulus_kernel(%arg0: i32, %arg1: memref<192x128xf32, #tpu.memory_space<vmem>>, %arg2: memref<192x128xf32, #tpu.memory_space<vmem>>, %arg3: memref<192x128xf32, #tpu.memory_space<vmem>>) attributes {dimension_semantics = [#tpu.dimension_semantics<parallel>], iteration_bounds = array<i64: 1>, scalar_prefetch = 0 : i64, scratch_operands = 0 : i64, tpu.core_type = #tpu.core_type<tc>, window_params = [{transform_indices = @transform_0, window_bounds = array<i64: 192, 128>}, {transform_indices = @transform_1, window_bounds = array<i64: 192, 128>}, {transform_indices = @transform_2, window_bounds = array<i64: 192, 128>}]} {
    %c0 = arith.constant 0 : index
    %c0_0 = arith.constant 0 : index
    %0 = vector.load %arg1[%c0, %c0_0] : memref<192x128xf32, #tpu.memory_space<vmem>>, vector<192x128xf32>
    %c0_1 = arith.constant 0 : index
    %c0_2 = arith.constant 0 : index
    %1 = vector.load %arg2[%c0_1, %c0_2] : memref<192x128xf32, #tpu.memory_space<vmem>>, vector<192x128xf32>
    %2 = arith.mulf %0, %0 : vector<192x128xf32>
    %3 = arith.mulf %1, %1 : vector<192x128xf32>
    %4 = arith.addf %2, %3 : vector<192x128xf32>
    %5 = math.sqrt %4 : vector<192x128xf32>
    %c0_3 = arith.constant 0 : index
    %c0_4 = arith.constant 0 : index
    %6 = vector.load %arg3[%c0_3, %c0_4] : memref<192x128xf32, #tpu.memory_space<vmem>>, vector<192x128xf32>
    tpu.vector_store %arg3[%c0_3, %c0_4], %5 {strides = array<i32>} : memref<192x128xf32, #tpu.memory_space<vmem>>, vector<192x128xf32>,
    return
  }
  func.func @transform_0(%arg0: i32) -> (i32, i32) {
    %c0_i32 = arith.constant 0 : i32
    %c0_i32_0 = arith.constant 0 : i32
    return %arg0, %c0_i32 : i32, i32
  }
  func.func @transform_1(%arg0: i32) -> (i32, i32) {
    %c0_i32 = arith.constant 0 : i32
    %c0_i32_0 = arith.constant 0 : i32
    return %arg0, %c0_i32 : i32, i32
  }
  func.func @transform_2(%arg0: i32) -> (i32, i32) {
    %c0_i32 = arith.constant 0 : i32
    %c0_i32_0 = arith.constant 0 : i32
    return %arg0, %c0_i32 : i32, i32
  }
}

module attributes {stable_mosaic.version = 11 : i64} {
  func.func @_modulus_kernel(%arg0: i32, %arg1: memref<256x128xf32, #tpu.memory_space<vmem>>, %arg2: memref<256x128xf32, #tpu.memory_space<vmem>>, %arg3: memref<256x128xf32, #tpu.memory_space<vmem>>) attributes {dimension_semantics = [#tpu.dimension_semantics<parallel>], iteration_bounds = array<i64: 3>, scalar_prefetch = 0 : i64, scratch_operands = 0 : i64, tpu.core_type = #tpu.core_type<tc>, window_params = [{transform_indices = @transform_0, window_bounds = array<i64: 256, 128>}, {transform_indices = @transform_1, window_bounds = array<i64: 256, 128>}, {transform_indices = @transform_2, window_bounds = array<i64: 256, 128>}]} {
    %c0 = arith.constant 0 : index
    %c0_0 = arith.constant 0 : index
    %0 = vector.load %arg1[%c0, %c0_0] : memref<256x128xf32, #tpu.memory_space<vmem>>, vector<256x128xf32>
    %c0_1 = arith.constant 0 : index
    %c0_2 = arith.constant 0 : index
    %1 = vector.load %arg2[%c0_1, %c0_2] : memref<256x128xf32, #tpu.memory_space<vmem>>, vector<256x128xf32>
    %2 = arith.mulf %0, %0 : vector<256x128xf32>
    %3 = arith.mulf %1, %1 : vector<256x128xf32>
    %4 = arith.addf %2, %3 : vector<256x128xf32>
    %5 = math.sqrt %4 : vector<256x128xf32>
    %c0_3 = arith.constant 0 : index
    %c0_4 = arith.constant 0 : index
    %6 = vector.load %arg3[%c0_3, %c0_4] : memref<256x128xf32, #tpu.memory_space<vmem>>, vector<256x128xf32>
    tpu.vector_store %arg3[%c0_3, %c0_4], %5 {strides = array<i32>} : memref<256x128xf32, #tpu.memory_space<vmem>>, vector<256x128xf32>,
    return
  }
  func.func @transform_0(%arg0: i32) -> (i32, i32) {
    %c0_i32 = arith.constant 0 : i32
    %c0_i32_0 = arith.constant 0 : i32
    return %arg0, %c0_i32 : i32, i32
  }
  func.func @transform_1(%arg0: i32) -> (i32, i32) {
    %c0_i32 = arith.constant 0 : i32
    %c0_i32_0 = arith.constant 0 : i32
    return %arg0, %c0_i32 : i32, i32
  }
  func.func @transform_2(%arg0: i32) -> (i32, i32) {
    %c0_i32 = arith.constant 0 : i32
    %c0_i32_0 = arith.constant 0 : i32
    return %arg0, %c0_i32 : i32, i32
  }
}

module attributes {stable_mosaic.version = 11 : i64} {
  func.func @_project_kernel(%arg0: i32, %arg1: memref<486x256xf32, #tpu.memory_space<vmem>>, %arg2: memref<16x256xf32, #tpu.memory_space<vmem>>, %arg3: memref<486x16xf32, #tpu.memory_space<vmem>>) attributes {dimension_semantics = [#tpu.dimension_semantics<arbitrary>], iteration_bounds = array<i64: 1>, scalar_prefetch = 0 : i64, scratch_operands = 0 : i64, tpu.core_type = #tpu.core_type<tc>, window_params = [{pipeline_mode = #tpu.pipeline_mode<synchronous>, transform_indices = @transform_0, window_bounds = array<i64: 486, 256>}, {pipeline_mode = #tpu.pipeline_mode<synchronous>, transform_indices = @transform_1, window_bounds = array<i64: 16, 256>}, {pipeline_mode = #tpu.pipeline_mode<synchronous>, transform_indices = @transform_2, window_bounds = array<i64: 486, 16>}]} {
    %c0 = arith.constant 0 : index
    %c0_0 = arith.constant 0 : index
    %0 = vector.load %arg1[%c0, %c0_0] : memref<486x256xf32, #tpu.memory_space<vmem>>, vector<486x256xf32>
    %c0_1 = arith.constant 0 : index
    %c0_2 = arith.constant 0 : index
    %1 = vector.load %arg2[%c0_1, %c0_2] : memref<16x256xf32, #tpu.memory_space<vmem>>, vector<16x256xf32>
    %cst = arith.constant dense<0.000000e+00> : vector<486x16xf32>
    %2 = tpu.matmul %0, %1, %cst {dimension_numbers = #tpu.dot_dimension_numbers<[1], [1], [0], [0], [0, 0, 1, 0], [], []>} : vector<486x256xf32>, vector<16x256xf32>, vector<486x16xf32> -> vector<486x16xf32>
    %c0_3 = arith.constant 0 : index
    %c0_4 = arith.constant 0 : index
    %3 = vector.load %arg3[%c0_3, %c0_4] : memref<486x16xf32, #tpu.memory_space<vmem>>, vector<486x16xf32>
    tpu.vector_store %arg3[%c0_3, %c0_4], %2 {strides = array<i32>} : memref<486x16xf32, #tpu.memory_space<vmem>>, vector<486x16xf32>,
    return
  }
  func.func @transform_0(%arg0: i32) -> (i32, i32) {
    %c0_i32 = arith.constant 0 : i32
    %c0_i32_0 = arith.constant 0 : i32
    %c0_i32_1 = arith.constant 0 : i32
    return %c0_i32, %c0_i32_0 : i32, i32
  }
  func.func @transform_1(%arg0: i32) -> (i32, i32) {
    %c0_i32 = arith.constant 0 : i32
    %c0_i32_0 = arith.constant 0 : i32
    %c0_i32_1 = arith.constant 0 : i32
    return %c0_i32, %c0_i32_0 : i32, i32
  }
  func.func @transform_2(%arg0: i32) -> (i32, i32) {
    %c0_i32 = arith.constant 0 : i32
    %c0_i32_0 = arith.constant 0 : i32
    %c0_i32_1 = arith.constant 0 : i32
    return %c0_i32, %c0_i32_0 : i32, i32
  }
}

module attributes {stable_mosaic.version = 11 : i64} {
  func.func @_classifier_kernel(%arg0: i32, %arg1: memref<2x3888xf32, #tpu.memory_space<vmem>>, %arg2: memref<10x3888xf32, #tpu.memory_space<vmem>>, %arg3: memref<1x10xf32, #tpu.memory_space<vmem>>, %arg4: memref<2x10xf32, #tpu.memory_space<vmem>>) attributes {dimension_semantics = [#tpu.dimension_semantics<arbitrary>], iteration_bounds = array<i64: 1>, scalar_prefetch = 0 : i64, scratch_operands = 0 : i64, tpu.core_type = #tpu.core_type<tc>, window_params = [{pipeline_mode = #tpu.pipeline_mode<synchronous>, transform_indices = @transform_0, window_bounds = array<i64: 2, 3888>}, {pipeline_mode = #tpu.pipeline_mode<synchronous>, transform_indices = @transform_1, window_bounds = array<i64: 10, 3888>}, {pipeline_mode = #tpu.pipeline_mode<synchronous>, transform_indices = @transform_2, window_bounds = array<i64: 1, 10>}, {pipeline_mode = #tpu.pipeline_mode<synchronous>, transform_indices = @transform_3, window_bounds = array<i64: 2, 10>}]} {
    %c0 = arith.constant 0 : index
    %c0_0 = arith.constant 0 : index
    %0 = vector.load %arg1[%c0, %c0_0] : memref<2x3888xf32, #tpu.memory_space<vmem>>, vector<2x3888xf32>
    %c0_1 = arith.constant 0 : index
    %c0_2 = arith.constant 0 : index
    %1 = vector.load %arg2[%c0_1, %c0_2] : memref<10x3888xf32, #tpu.memory_space<vmem>>, vector<10x3888xf32>
    %cst = arith.constant dense<0.000000e+00> : vector<2x10xf32>
    %2 = tpu.matmul %0, %1, %cst {dimension_numbers = #tpu.dot_dimension_numbers<[1], [1], [0], [0], [0, 0, 1, 0], [], []>} : vector<2x3888xf32>, vector<10x3888xf32>, vector<2x10xf32> -> vector<2x10xf32>
    %c0_3 = arith.constant 0 : index
    %c0_4 = arith.constant 0 : index
    %3 = vector.load %arg3[%c0_3, %c0_4] : memref<1x10xf32, #tpu.memory_space<vmem>>, vector<1x10xf32>
    %4 = vector.broadcast %3 : vector<1x10xf32> to vector<2x10xf32>
    %5 = arith.addf %2, %4 : vector<2x10xf32>
    %c0_5 = arith.constant 0 : index
    %c0_6 = arith.constant 0 : index
    %6 = vector.load %arg4[%c0_5, %c0_6] : memref<2x10xf32, #tpu.memory_space<vmem>>, vector<2x10xf32>
    tpu.vector_store %arg4[%c0_5, %c0_6], %5 {strides = array<i32>} : memref<2x10xf32, #tpu.memory_space<vmem>>, vector<2x10xf32>,
    return
  }
  func.func @transform_0(%arg0: i32) -> (i32, i32) {
    %c0_i32 = arith.constant 0 : i32
    %c0_i32_0 = arith.constant 0 : i32
    %c0_i32_1 = arith.constant 0 : i32
    return %c0_i32, %c0_i32_0 : i32, i32
  }
  func.func @transform_1(%arg0: i32) -> (i32, i32) {
    %c0_i32 = arith.constant 0 : i32
    %c0_i32_0 = arith.constant 0 : i32
    %c0_i32_1 = arith.constant 0 : i32
    return %c0_i32, %c0_i32_0 : i32, i32
  }
  func.func @transform_2(%arg0: i32) -> (i32, i32) {
    %c0_i32 = arith.constant 0 : i32
    %c0_i32_0 = arith.constant 0 : i32
    %c0_i32_1 = arith.constant 0 : i32
    return %c0_i32, %c0_i32_0 : i32, i32
  }
  func.func @transform_3(%arg0: i32) -> (i32, i32) {
    %c0_i32 = arith.constant 0 : i32
    %c0_i32_0 = arith.constant 0 : i32
    %c0_i32_1 = arith.constant 0 : i32
    return %c0_i32, %c0_i32_0 : i32, i32
  }
}

</mosaic_0001>

<bundles_post_ra>
// kernel: a_call__.5
= control target key start
LH: loop header
LB: loop body
LE: loop exit
PB: predicated region body
PF: predicated region fallthrough
CT: control target
= control target key end

     0   :  { %vm22_vm0 = vcmask 1042432   ;;  %v128_v10 = vmov 0   ;;  %v129_v12 = vmov 839922192   ;;  %v42_v14 = vlaneseq  ;;  %s180_s0 = inlined_call_operand.vmem [shape: f32[2,3,256], index: 0, kind: input, shape index: {}]   ;;  %s181_s1 = inlined_call_operand.vmem [shape: f32[1,3,1], index: 1, kind: input, shape index: {}]   ;;  %s182_s2 = inlined_call_operand.vmem [shape: f32[1,3,1], index: 2, kind: input, shape index: {}]   ;;  %s183_s3 = inlined_call_operand.vmem [shape: f32[2,3,256], index: 3, kind: output, shape index: {}]  }
   0x1   :  { %v14_v0 = vld [vmem:[%s180_s0] sm:$0x77]  ;;  %v15_v1 = vld [vmem:[%s180_s0 + $0x8] sm:$0x77]  ;;  %122 = vset.pattern.permute.xlu0 %v128_v10  ;;  %123 = vset.pattern.permute.xlu1 %v128_v10  ;;  %v40_v13 = vunpack.c.l.s4 %v129_v12 }
   0x2   :  { %v18_v2 = vcombine.high %v14_v0, %v14_v0  ;;  %v23_v3 = vsel %vm22_vm0, %v14_v0, 0.0  ;;  %v19_v4 = vcombine.high %v15_v1, %v15_v1  ;;  %v28_v6 = vsel %vm22_vm0, %v15_v1, 0.0  ;;  %v84_v11 = vld [vmem:[%s181_s1] sm:$0x7] }
   0x3   :  { %v41_v16 = vunpack.c.0.s8 %v40_v13  ;;  %v43_v17 = vshrl.u32 %v42_v14, 7  ;;  %v99_v37 = vld [vmem:[%s182_s2] sm:$0x7] }
   0x4   :  { %v24_v5 = vsel %vm22_vm0, %v18_v2, 0.0  ;;  %v29_v7 = vsel %vm22_vm0, %v19_v4, 0.0 }
   0x5   :  { %v25_v8 = vadd.f32 %v24_v5, %v23_v3  ;;  %v30_v9 = vadd.f32 %v29_v7, %v28_v6  ;;  %v44_v21 = vsub.s32 %v41_v16, %v43_v17 }
   0x7   :  { %26 = vadd.xlane.f32.xlu0 %v25_v8 }
   0xb   :  { %31 = vadd.xlane.f32.xlu0 %v30_v9 }
  0x21   :  { %87 = vperm.xlu0 %122, %v84_v11  }
  0x94   :  { %v27_v15 = vpop.xlane.xlu0 %26 }
  0x95   :  { %v33_v19 = vsel %vm22_vm0, %v27_v15, 0.0 }
  0x98   :  { %v32_v18 = vpop.xlane.xlu0 %31 }
  0x99   :  { %v34_v20 = vsel %vm22_vm0, %v32_v18, 0.0 }
  0x9a   :  { %v35_v22 = vadd.f32 %v34_v20, %v33_v19 }
  0x9c   :  { %v37_v23 = vmul.f32 0.001953125, %v35_v22 }
  0x9e   :  { %v45_v24 = vrot.slane %v37_v23, %v44_v21 }
  0xa0   :  { %v48_v25 = vsub.f32 %v15_v1, %v45_v24  ;;  %v47_v26 = vsub.f32 %v14_v0, %v45_v24  ;;  %v88_v45 = vpop.permute.xlu0 %87 }
  0xa1   :  { %v95_v49 = vrot.slane %v88_v45, %v44_v21 }
  0xa2   :  { %v49_v27 = vmul.f32 %v47_v26, %v47_v26  ;;  %v50_v28 = vmul.f32 %v48_v25, %v48_v25 }
  0xa4   :  { %v53_v29 = vcombine.high %v49_v27, %v49_v27  ;;  %v54_v30 = vcombine.high %v50_v28, %v50_v28  ;;  %v57_v31 = vsel %vm22_vm0, %v49_v27, 0.0  ;;  %v62_v35 = vsel %vm22_vm0, %v50_v28, 0.0 }
  0xa6   :  { %v58_v32 = vsel %vm22_vm0, %v53_v29, 0.0  ;;  %v63_v34 = vsel %vm22_vm0, %v54_v30, 0.0 }
  0xa7   :  { %v59_v33 = vadd.f32 %v58_v32, %v57_v31  ;;  %v64_v36 = vadd.f32 %v63_v34, %v62_v35 }
  0xa9   :  { %60 = vadd.xlane.f32.xlu1 %v59_v33 }
  0xad   :  { %65 = vadd.xlane.f32.xlu1 %v64_v36 }
  0xbe   :  { %102 = vperm.xlu1 %123, %v99_v37  }
 0x136   :  { %v61_v38 = vpop.xlane.xlu1 %60 }
 0x137   :  { %v67_v40 = vsel %vm22_vm0, %v61_v38, 0.0 }
 0x13a   :  { %v66_v39 = vpop.xlane.xlu1 %65 }
 0x13b   :  { %v68_v41 = vsel %vm22_vm0, %v66_v39, 0.0 }
 0x13c   :  { %v69_v42 = vadd.f32 %v68_v41, %v67_v40 }
 0x13e   :  { %v70_v43 = vmul.f32 0.001953125, %v69_v42  ;;  %v103_v47 = vpop.permute.xlu1 %102 }
 0x13f   :  { %v110_v52 = vrot.slane %v103_v47, %v44_v21 }
 0x140   :  { %v71_v44 = vadd.f32 1e-05, %v70_v43 }
 0x142   :  { %126 = vrsqrt.f32 %v71_v44 }
 0x14c   :  { %v127_v46 = vpop.eup %126 }
 0x14d   :  { %v80_v48 = vrot.slane %v127_v46, %v44_v21 }
 0x14f   :  { %v82_v50 = vmul.f32 %v80_v48, %v47_v26  ;;  %v83_v51 = vmul.f32 %v80_v48, %v48_v25 }
 0x151   :  { %v97_v53 = vmul.f32 %v95_v49, %v82_v50  ;;  %v98_v54 = vmul.f32 %v95_v49, %v83_v51 }
 0x153   :  { %v112_v55 = vadd.f32 %v110_v52, %v97_v53  ;;  %v113_v56 = vadd.f32 %v110_v52, %v98_v54 }
 0x155   :  { %114 = vst [vmem:[%s183_s3] sm:$0x77] %v112_v55  ;;  %115 = vst [vmem:[%s183_s3 + $0x8] sm:$0x77] %v113_v56 }

// kernel: a_call__.6
= control target key start
LH: loop header
LB: loop body
LE: loop exit
PB: predicated region body
PF: predicated region fallthrough
CT: control target
= control target key end

     0   :  { %s844_s0 = inlined_call_operand.vmem [shape: f32[192,128], index: 0, kind: input, shape index: {}]   ;;  %s845_s1 = inlined_call_operand.vmem [shape: f32[192,128], index: 1, kind: input, shape index: {}]   ;;  %s846_s2 = inlined_call_operand.vmem [shape: f32[192,128], index: 2, kind: output, shape index: {}]  }
   0x1   :  { %v11_v0 = vld [vmem:[%s844_s0] sm:$0xff]  ;;  %v12_v2 = vld [vmem:[%s844_s0 + $0x8] sm:$0xff]  ;;  %v13_v7 = vld [vmem:[%s844_s0 + $0x10] sm:$0xff] }
   0x2   :  { %v35_v1 = vld [vmem:[%s845_s1] sm:$0xff]  ;;  %v59_v3 = vmul.f32 %v11_v0, %v11_v0  ;;  %v36_v5 = vld [vmem:[%s845_s1 + $0x8] sm:$0xff]  ;;  %v60_v6 = vmul.f32 %v12_v2, %v12_v2  ;;  %v37_v8 = vld [vmem:[%s845_s1 + $0x10] sm:$0xff]  ;;  %v61_v10 = vmul.f32 %v13_v7, %v13_v7 }
   0x3   :  { %v83_v4 = vmul.f32 %v35_v1, %v35_v1  ;;  %v84_v9 = vmul.f32 %v36_v5, %v36_v5  ;;  %v85_v11 = vmul.f32 %v37_v8, %v37_v8  ;;  %v14_v12 = vld [vmem:[%s844_s0 + $0x18] sm:$0xff]  ;;  %v15_v14 = vld [vmem:[%s844_s0 + $0x20] sm:$0xff]  ;;  %v16_v23 = vld [vmem:[%s844_s0 + $0x28] sm:$0xff] }
   0x4   :  { %v38_v13 = vld [vmem:[%s845_s1 + $0x18] sm:$0xff]  ;;  %v62_v16 = vmul.f32 %v14_v12, %v14_v12  ;;  %v39_v18 = vld [vmem:[%s845_s1 + $0x20] sm:$0xff]  ;;  %v63_v21 = vmul.f32 %v15_v14, %v15_v14  ;;  %v40_v24 = vld [vmem:[%s845_s1 + $0x28] sm:$0xff]  ;;  %v64_v29 = vmul.f32 %v16_v23, %v16_v23 }
   0x5   :  { %v417_v15 = vadd.f32 %v83_v4, %v59_v3  ;;  %v86_v17 = vmul.f32 %v38_v13, %v38_v13  ;;  %v422_v19 = vadd.f32 %v84_v9, %v60_v6  ;;  %v424_v20 = vadd.f32 %v85_v11, %v61_v10  ;;  %v17_v25 = vld [vmem:[%s844_s0 + $0x30] sm:$0xff]  ;;  %v18_v27 = vld [vmem:[%s844_s0 + $0x38] sm:$0xff]  ;;  %v19_v38 = vld [vmem:[%s844_s0 + $0x40] sm:$0xff] }
   0x6   :  { %v87_v22 = vmul.f32 %v39_v18, %v39_v18  ;;  %v41_v26 = vld [vmem:[%s845_s1 + $0x30] sm:$0xff]  ;;  %v42_v28 = vld [vmem:[%s845_s1 + $0x38] sm:$0xff]  ;;  %v88_v32 = vmul.f32 %v40_v24, %v40_v24  ;;  %v65_v33 = vmul.f32 %v17_v25, %v17_v25  ;;  %v66_v36 = vmul.f32 %v18_v27, %v18_v27  ;;  %v43_v40 = vld [vmem:[%s845_s1 + $0x40] sm:$0xff] }
   0x7   :  { %327 = vrsqrt.f32 %v417_v15  ;;  %vm133_vm0 = vcmp.eq.f32.partialorder %v417_v15, inf  ;;  %vm135_vm1 = vcmp.eq.f32.partialorder %v417_v15, 0.0  ;;  %v449_v30 = vadd.f32 %v86_v17, %v62_v16  ;;  %v20_v41 = vld [vmem:[%s844_s0 + $0x48] sm:$0xff]  ;;  %v21_v44 = vld [vmem:[%s844_s0 + $0x50] sm:$0xff]  ;;  %v22_v6 = vld [vmem:[%s844_s0 + $0x58] sm:$0xff] }
   0x8   :  { %329 = vrsqrt.f32 %v422_v19  ;;  %v451_v31 = vadd.f32 %v87_v22, %v63_v21  ;;  %v136_v34 = vand.u32 2147483648, %v417_v15  ;;  %v89_v35 = vmul.f32 %v41_v26, %v41_v26  ;;  %v44_v42 = vld [vmem:[%s845_s1 + $0x48] sm:$0xff]  ;;  %v45_v45 = vld [vmem:[%s845_s1 + $0x50] sm:$0xff]  ;;  %v46_v14 = vld [vmem:[%s845_s1 + $0x58] sm:$0xff] }
   0x9   :  { %331 = vrsqrt.f32 %v424_v20  ;;  %v90_v37 = vmul.f32 %v42_v28, %v42_v28  ;;  %vm140_vm2 = vcmp.eq.f32.partialorder %v422_v19, inf  ;;  %vm142_vm3 = vcmp.eq.f32.partialorder %v422_v19, 0.0  ;;  %v47_v18 = vld [vmem:[%s845_s1 + $0x60] sm:$0xff]  ;;  %v48_v22 = vld [vmem:[%s845_s1 + $0x68] sm:$0xff]  ;;  %v25_v23 = vld [vmem:[%s844_s0 + $0x70] sm:$0xff] }
   0xa   :  { %v143_v39 = vand.u32 2147483648, %v422_v19  ;;  %333 = vrsqrt.f32 %v449_v30  ;;  %vm147_vm4 = vcmp.eq.f32.partialorder %v424_v20, inf  ;;  %vm149_vm5 = vcmp.eq.f32.partialorder %v424_v20, 0.0 }
   0xb   :  { %v150_v43 = vand.u32 2147483648, %v424_v20  ;;  %335 = vrsqrt.f32 %v451_v31  ;;  %v480_v46 = vadd.f32 %v88_v32, %v64_v29  ;;  %v482_v47 = vadd.f32 %v89_v35, %v65_v33  ;;  %v49_v29 = vld [vmem:[%s845_s1 + $0x70] sm:$0xff] }
   0xc   :  { %v484_v48 = vadd.f32 %v90_v37, %v66_v36  ;;  %v67_v49 = vmul.f32 %v19_v38, %v19_v38  ;;  %vm154_vm6 = vcmp.eq.f32.partialorder %v449_v30, inf  ;;  %v91_v50 = vmul.f32 %v43_v40, %v43_v40 }
   0xd   :  { %v68_v51 = vmul.f32 %v20_v41, %v20_v41  ;;  %v92_v52 = vmul.f32 %v44_v42, %v44_v42  ;;  %vm156_vm7 = vcmp.eq.f32.partialorder %v449_v30, 0.0  ;;  %337 = vrsqrt.f32 %v480_v46 }
   0xe   :  { %v69_v53 = vmul.f32 %v21_v44, %v21_v44  ;;  %v93_v54 = vmul.f32 %v45_v45, %v45_v45  ;;  %v157_v56 = vand.u32 2147483648, %v449_v30  ;;  %vm161_vm8 = vcmp.eq.f32.partialorder %v451_v31, inf }
   0xf   :  { %vm163_vm9 = vcmp.eq.f32.partialorder %v451_v31, 0.0  ;;  %339 = vrsqrt.f32 %v482_v47  ;;  %v164_v59 = vand.u32 2147483648, %v451_v31  ;;  %vm168_vm10 = vcmp.eq.f32.partialorder %v480_v46, inf }
  0x10   :  { %341 = vrsqrt.f32 %v484_v48  ;;  %vm170_vm11 = vcmp.eq.f32.partialorder %v480_v46, 0.0  ;;  %v499_v62 = vadd.f32 %v91_v50, %v67_v49  ;;  %v501_v63 = vadd.f32 %v92_v52, %v68_v51  ;;  %v26_v52 = vld [vmem:[%s844_s0 + $0x78] sm:$0xff] }
  0x11   :  { %v328_v55 = vpop.eup %327  ;;  %v171_v2 = vand.u32 2147483648, %v480_v46  ;;  %v508_v3 = vadd.f32 %v93_v54, %v69_v53  ;;  %vm175_vm12 = vcmp.eq.f32.partialorder %v482_v47, inf  ;;  %vm177_vm13 = vcmp.eq.f32.partialorder %v482_v47, 0.0  ;;  %v50_v53 = vld [vmem:[%s845_s1 + $0x78] sm:$0xff] }
  0x12   :  { %v330_v57 = vpop.eup %329  ;;  %v132_v58 = vmul.f32 %v328_v55, %v417_v15  ;;  %343 = vrsqrt.f32 %v499_v62  ;;  %v178_v10 = vand.u32 2147483648, %v482_v47  ;;  %vm182_vm14 = vcmp.eq.f32.partialorder %v484_v48, inf }
  0x13   :  { %v332_v60 = vpop.eup %331  ;;  %v139_v61 = vmul.f32 %v330_v57, %v422_v19  ;;  %345 = vrsqrt.f32 %v501_v63  ;;  %vm184_vm15 = vcmp.eq.f32.partialorder %v484_v48, 0.0  ;;  %v70_v17 = vmul.f32 %v22_v6, %v22_v6 }
  0x14   :  { %v134_v0 = vsel %vm133_vm0, %v417_v15, %v132_v58  ;;  %v146_v1 = vmul.f32 %v332_v60, %v424_v20  ;;  %v334_v7 = vpop.eup %333  ;;  %v23_v15 = vld [vmem:[%s844_s0 + $0x60] sm:$0xff]  ;;  %347 = vrsqrt.f32 %v508_v3  ;;  %v185_v21 = vand.u32 2147483648, %v484_v48 }
  0x15   :  { %v137_v4 = vsel %vm135_vm1, %v136_v34, %v134_v0  ;;  %v141_v5 = vsel %vm140_vm2, %v422_v19, %v139_v61  ;;  %v336_v11 = vpop.eup %335  ;;  %v153_v13 = vmul.f32 %v334_v7, %v449_v30  ;;  %v24_v19 = vld [vmem:[%s844_s0 + $0x68] sm:$0xff]  ;;  %vm189_vm0 = vcmp.eq.f32.partialorder %v499_v62, inf }
  0x16   :  { %299 = vst [vmem:[%s846_s2] sm:$0xff] %v137_v4  ;;  %v144_v8 = vsel %vm142_vm3, %v143_v39, %v141_v5  ;;  %v148_v9 = vsel %vm147_vm4, %v424_v20, %v146_v1  ;;  %v160_v16 = vmul.f32 %v336_v11, %v451_v31  ;;  %vm191_vm1 = vcmp.eq.f32.partialorder %v499_v62, 0.0  ;;  %v27_v5 = vld [vmem:[%s844_s0 + $0x80] sm:$0xff]  ;;  %v28_v7 = vld [vmem:[%s844_s0 + $0x88] sm:$0xff] }
  0x17   :  { %300 = vst [vmem:[%s846_s2 + $0x8] sm:$0xff] %v144_v8  ;;  %v151_v12 = vsel %vm149_vm5, %v150_v43, %v148_v9  ;;  %v155_v20 = vsel %vm154_vm6, %v449_v30, %v153_v13  ;;  %v338_v24 = vpop.eup %337  ;;  %v94_v27 = vmul.f32 %v46_v14, %v46_v14  ;;  %v71_v28 = vmul.f32 %v23_v15, %v23_v15  ;;  %v52_v8 = vld [vmem:[%s845_s1 + $0x88] sm:$0xff] }
  0x18   :  { %301 = vst [vmem:[%s846_s2 + $0x10] sm:$0xff] %v151_v12  ;;  %v158_v25 = vsel %vm156_vm7, %v157_v56, %v155_v20  ;;  %v162_v26 = vsel %vm161_vm8, %v451_v31, %v160_v16  ;;  %v167_v30 = vmul.f32 %v338_v24, %v480_v46  ;;  %v95_v34 = vmul.f32 %v47_v18, %v47_v18  ;;  %v30_v18 = vld [vmem:[%s844_s0 + $0x98] sm:$0xff]  ;;  %v31_v20 = vld [vmem:[%s844_s0 + $0xa0] sm:$0xff] }
  0x19   :  { %v340_v32 = vpop.eup %339  ;;  %302 = vst [vmem:[%s846_s2 + $0x18] sm:$0xff] %v158_v25  ;;  %v165_v33 = vsel %vm163_vm9, %v164_v59, %v162_v26  ;;  %v72_v35 = vmul.f32 %v24_v19, %v24_v19  ;;  %v586_v38 = vadd.f32 %v94_v27, %v70_v17  ;;  %v96_v39 = vmul.f32 %v48_v22, %v48_v22  ;;  %v54_v19 = vld [vmem:[%s845_s1 + $0x98] sm:$0xff] }
  0x1a   :  { %v342_v36 = vpop.eup %341  ;;  %303 = vst [vmem:[%s846_s2 + $0x20] sm:$0xff] %v165_v33  ;;  %v174_v37 = vmul.f32 %v340_v32, %v482_v47  ;;  %v73_v40 = vmul.f32 %v25_v23, %v25_v23  ;;  %v169_v31 = vsel %vm168_vm10, %v480_v46, %v167_v30  ;;  %v592_v42 = vadd.f32 %v95_v34, %v71_v28  ;;  %v55_v23 = vld [vmem:[%s845_s1 + $0xa0] sm:$0xff] }
  0x1b   :  { %v181_v41 = vmul.f32 %v342_v36, %v484_v48  ;;  %v97_v43 = vmul.f32 %v49_v29, %v49_v29  ;;  %v172_v44 = vsel %vm170_vm11, %v171_v2, %v169_v31  ;;  %v192_v49 = vand.u32 2147483648, %v499_v62 }
  0x1c   :  { %v176_v45 = vsel %vm175_vm12, %v482_v47, %v174_v37  ;;  %349 = vrsqrt.f32 %v586_v38  ;;  %v344_v50 = vpop.eup %343  ;;  %304 = vst [vmem:[%s846_s2 + $0x28] sm:$0xff] %v172_v44  ;;  %vm196_vm2 = vcmp.eq.f32.partialorder %v501_v63, inf  ;;  %vm198_vm3 = vcmp.eq.f32.partialorder %v501_v63, 0.0 }
  0x1d   :  { %v179_v51 = vsel %vm177_vm13, %v178_v10, %v176_v45  ;;  %v183_v46 = vsel %vm182_vm14, %v484_v48, %v181_v41  ;;  %v188_v54 = vmul.f32 %v344_v50, %v499_v62  ;;  %v199_v55 = vand.u32 2147483648, %v501_v63  ;;  %v346_v56 = vpop.eup %345  ;;  %v32_v41 = vld [vmem:[%s844_s0 + $0xa8] sm:$0xff] }
  0x1e   :  { %305 = vst [vmem:[%s846_s2 + $0x30] sm:$0xff] %v179_v51  ;;  %v186_v47 = vsel %vm184_vm15, %v185_v21, %v183_v46  ;;  %351 = vrsqrt.f32 %v592_v42  ;;  %vm203_vm4 = vcmp.eq.f32.partialorder %v508_v3, inf  ;;  %v206_v57 = vand.u32 2147483648, %v508_v3  ;;  %v348_v48 = vpop.eup %347 }
  0x1f   :  { %306 = vst [vmem:[%s846_s2 + $0x38] sm:$0xff] %v186_v47  ;;  %v630_v58 = vadd.f32 %v96_v39, %v72_v35  ;;  %v632_v59 = vadd.f32 %v97_v43, %v73_v40  ;;  %v190_v60 = vsel %vm189_vm0, %v499_v62, %v188_v54  ;;  %v195_v61 = vmul.f32 %v346_v56, %v501_v63  ;;  %v51_v62 = vld [vmem:[%s845_s1 + $0x80] sm:$0xff]  ;;  %v56_v43 = vld [vmem:[%s845_s1 + $0xa8] sm:$0xff]  ;;  %v33_v56 = vld [vmem:[%s844_s0 + $0xb0] sm:$0xff] }
  0x20   :  { %v74_v0 = vmul.f32 %v26_v52, %v26_v52  ;;  %v98_v1 = vmul.f32 %v50_v53, %v50_v53  ;;  %v193_v2 = vsel %vm191_vm1, %v192_v49, %v190_v60  ;;  %v202_v4 = vmul.f32 %v348_v48, %v508_v3  ;;  %v34_v60 = vld [vmem:[%s844_s0 + $0xb8] sm:$0xff] }
  0x21   :  { %vm205_vm5 = vcmp.eq.f32.partialorder %v508_v3, 0.0  ;;  %353 = vrsqrt.f32 %v630_v58  ;;  %307 = vst [vmem:[%s846_s2 + $0x40] sm:$0xff] %v193_v2  ;;  %v197_v6 = vsel %vm196_vm2, %v501_v63, %v195_v61  ;;  %vm210_vm6 = vcmp.eq.f32.partialorder %v586_v38, inf  ;;  %v29_v63 = vld [vmem:[%s844_s0 + $0x90] sm:$0xff]  ;;  %v58_v61 = vld [vmem:[%s845_s1 + $0xb8] sm:$0xff] }
  0x22   :  { %355 = vrsqrt.f32 %v632_v59  ;;  %v200_v9 = vsel %vm198_vm3, %v199_v55, %v197_v6  ;;  %v204_v10 = vsel %vm203_vm4, %v508_v3, %v202_v4  ;;  %vm212_vm7 = vcmp.eq.f32.partialorder %v586_v38, 0.0  ;;  %v53_v3 = vld [vmem:[%s845_s1 + $0x90] sm:$0xff] }
  0x23   :  { %308 = vst [vmem:[%s846_s2 + $0x48] sm:$0xff] %v200_v9  ;;  %v207_v11 = vsel %vm205_vm5, %v206_v57, %v204_v10  ;;  %v672_v12 = vadd.f32 %v98_v1, %v74_v0  ;;  %v75_v13 = vmul.f32 %v27_v5, %v27_v5  ;;  %v213_v14 = vand.u32 2147483648, %v586_v38  ;;  %v57_v57 = vld [vmem:[%s845_s1 + $0xb0] sm:$0xff] }
  0x24   :  { %309 = vst [vmem:[%s846_s2 + $0x50] sm:$0xff] %v207_v11  ;;  %v99_v15 = vmul.f32 %v51_v62, %v51_v62  ;;  %v76_v16 = vmul.f32 %v28_v7, %v28_v7  ;;  %v100_v17 = vmul.f32 %v52_v8, %v52_v8  ;;  %vm217_vm8 = vcmp.eq.f32.partialorder %v592_v42, inf }
  0x25   :  { %vm219_vm9 = vcmp.eq.f32.partialorder %v592_v42, 0.0  ;;  %v220_v22 = vand.u32 2147483648, %v592_v42  ;;  %357 = vrsqrt.f32 %v672_v12  ;;  %v77_v27 = vmul.f32 %v29_v63, %v29_v63 }
  0x26   :  { %v350_v21 = vpop.eup %349  ;;  %v701_v25 = vadd.f32 %v99_v15, %v75_v13  ;;  %v703_v26 = vadd.f32 %v100_v17, %v76_v16  ;;  %v101_v29 = vmul.f32 %v53_v3, %v53_v3  ;;  %v78_v32 = vmul.f32 %v30_v18, %v30_v18 }
  0x27   :  { %v209_v24 = vmul.f32 %v350_v21, %v586_v38  ;;  %v102_v33 = vmul.f32 %v54_v19, %v54_v19  ;;  %v79_v30 = vmul.f32 %v31_v20, %v31_v20  ;;  %v103_v36 = vmul.f32 %v55_v23, %v55_v23 }
  0x28   :  { %v352_v28 = vpop.eup %351  ;;  %359 = vrsqrt.f32 %v701_v25  ;;  %vm224_vm10 = vcmp.eq.f32.partialorder %v630_v58, inf  ;;  %vm226_vm11 = vcmp.eq.f32.partialorder %v630_v58, 0.0  ;;  %v227_v31 = vand.u32 2147483648, %v630_v58 }
  0x29   :  { %v211_v34 = vsel %vm210_vm6, %v586_v38, %v209_v24  ;;  %v216_v35 = vmul.f32 %v352_v28, %v592_v42  ;;  %361 = vrsqrt.f32 %v703_v26  ;;  %vm231_vm12 = vcmp.eq.f32.partialorder %v632_v59, inf }
  0x2a   :  { %v214_v37 = vsel %vm212_vm7, %v213_v14, %v211_v34  ;;  %v234_v38 = vand.u32 2147483648, %v632_v59  ;;  %v733_v50 = vadd.f32 %v101_v29, %v77_v27  ;;  %v735_v51 = vadd.f32 %v102_v33, %v78_v32 }
  0x2b   :  { %v354_v39 = vpop.eup %353  ;;  %310 = vst [vmem:[%s846_s2 + $0x58] sm:$0xff] %v214_v37  ;;  %v218_v40 = vsel %vm217_vm8, %v592_v42, %v216_v35  ;;  %vm233_vm13 = vcmp.eq.f32.partialorder %v632_v59, 0.0  ;;  %v742_v52 = vadd.f32 %v103_v36, %v79_v30  ;;  %v80_v53 = vmul.f32 %v32_v41, %v32_v41 }
  0x2c   :  { %v356_v44 = vpop.eup %355  ;;  %v221_v45 = vsel %vm219_vm9, %v220_v22, %v218_v40  ;;  %v223_v49 = vmul.f32 %v354_v39, %v630_v58  ;;  %363 = vrsqrt.f32 %v733_v50  ;;  %v104_v47 = vmul.f32 %v56_v43, %v56_v43 }
  0x2d   :  { %311 = vst [vmem:[%s846_s2 + $0x60] sm:$0xff] %v221_v45  ;;  %v230_v46 = vmul.f32 %v356_v44, %v632_v59  ;;  %365 = vrsqrt.f32 %v735_v51  ;;  %vm238_vm14 = vcmp.eq.f32.partialorder %v672_v12, inf  ;;  %vm240_vm15 = vcmp.eq.f32.partialorder %v672_v12, 0.0 }
  0x2e   :  { %v225_v42 = vsel %vm224_vm10, %v630_v58, %v223_v49  ;;  %vm245_vm0 = vcmp.eq.f32.partialorder %v701_v25, inf  ;;  %vm247_vm1 = vcmp.eq.f32.partialorder %v701_v25, 0.0  ;;  %367 = vrsqrt.f32 %v742_v52 }
  0x2f   :  { %v228_v54 = vsel %vm226_vm11, %v227_v31, %v225_v42  ;;  %v232_v55 = vsel %vm231_vm12, %v632_v59, %v230_v46  ;;  %v358_v48 = vpop.eup %357  ;;  %v241_v59 = vand.u32 2147483648, %v672_v12  ;;  %v248_v1 = vand.u32 2147483648, %v701_v25 }
  0x30   :  { %312 = vst [vmem:[%s846_s2 + $0x68] sm:$0xff] %v228_v54  ;;  %v235_v58 = vsel %vm233_vm13, %v234_v38, %v232_v55  ;;  %v237_v0 = vmul.f32 %v358_v48, %v672_v12  ;;  %v780_v2 = vadd.f32 %v104_v47, %v80_v53  ;;  %v81_v4 = vmul.f32 %v33_v56, %v33_v56 }
  0x31   :  { %313 = vst [vmem:[%s846_s2 + $0x70] sm:$0xff] %v235_v58  ;;  %v105_v5 = vmul.f32 %v57_v57, %v57_v57  ;;  %vm252_vm2 = vcmp.eq.f32.partialorder %v703_v26, inf  ;;  %v82_v7 = vmul.f32 %v34_v60, %v34_v60  ;;  %v106_v8 = vmul.f32 %v58_v61, %v58_v61 }
  0x32   :  { %v360_v6 = vpop.eup %359  ;;  %v239_v62 = vsel %vm238_vm14, %v672_v12, %v237_v0  ;;  %v255_v13 = vand.u32 2147483648, %v703_v26  ;;  %369 = vrsqrt.f32 %v780_v2  ;;  %vm254_vm3 = vcmp.eq.f32.partialorder %v703_v26, 0.0 }
  0x33   :  { %v362_v9 = vpop.eup %361  ;;  %v242_v10 = vsel %vm240_vm15, %v241_v59, %v239_v62  ;;  %v244_v11 = vmul.f32 %v360_v6, %v701_v25  ;;  %v129_v3 = vadd.f32 %v105_v5, %v81_v4  ;;  %v130_v14 = vadd.f32 %v106_v8, %v82_v7 }
  0x34   :  { %314 = vst [vmem:[%s846_s2 + $0x78] sm:$0xff] %v242_v10  ;;  %v251_v63 = vmul.f32 %v362_v9, %v703_v26  ;;  %vm259_vm4 = vcmp.eq.f32.partialorder %v733_v50, inf  ;;  %v262_v19 = vand.u32 2147483648, %v733_v50  ;;  %vm261_vm5 = vcmp.eq.f32.partialorder %v733_v50, 0.0 }
  0x35   :  { %v246_v12 = vsel %vm245_vm0, %v701_v25, %v244_v11  ;;  %371 = vrsqrt.f32 %v129_v3  ;;  %vm266_vm6 = vcmp.eq.f32.partialorder %v735_v51, inf  ;;  %v269_v22 = vand.u32 2147483648, %v735_v51 }
  0x36   :  { %v249_v15 = vsel %vm247_vm1, %v248_v1, %v246_v12  ;;  %v253_v16 = vsel %vm252_vm2, %v703_v26, %v251_v63  ;;  %v364_v17 = vpop.eup %363  ;;  %373 = vrsqrt.f32 %v130_v14  ;;  %vm268_vm7 = vcmp.eq.f32.partialorder %v735_v51, 0.0 }
  0x37   :  { %315 = vst [vmem:[%s846_s2 + $0x80] sm:$0xff] %v249_v15  ;;  %v256_v18 = vsel %vm254_vm3, %v255_v13, %v253_v16  ;;  %v366_v20 = vpop.eup %365  ;;  %v258_v21 = vmul.f32 %v364_v17, %v733_v50  ;;  %vm273_vm8 = vcmp.eq.f32.partialorder %v742_v52, inf  ;;  %v276_v26 = vand.u32 2147483648, %v742_v52 }
  0x38   :  { %316 = vst [vmem:[%s846_s2 + $0x88] sm:$0xff] %v256_v18  ;;  %v265_v23 = vmul.f32 %v366_v20, %v735_v51  ;;  %v368_v24 = vpop.eup %367  ;;  %vm275_vm9 = vcmp.eq.f32.partialorder %v742_v52, 0.0  ;;  %vm280_vm10 = vcmp.eq.f32.partialorder %v780_v2, inf  ;;  %v283_v34 = vand.u32 2147483648, %v780_v2 }
  0x39   :  { %v260_v25 = vsel %vm259_vm4, %v733_v50, %v258_v21  ;;  %v272_v29 = vmul.f32 %v368_v24, %v742_v52  ;;  %vm282_vm11 = vcmp.eq.f32.partialorder %v780_v2, 0.0  ;;  %vm287_vm12 = vcmp.eq.f32.partialorder %v129_v3, inf }
  0x3a   :  { %v263_v27 = vsel %vm261_vm5, %v262_v19, %v260_v25  ;;  %v267_v28 = vsel %vm266_vm6, %v735_v51, %v265_v23  ;;  %vm289_vm13 = vcmp.eq.f32.partialorder %v129_v3, 0.0  ;;  %v290_v40 = vand.u32 2147483648, %v129_v3 }
  0x3b   :  { %317 = vst [vmem:[%s846_s2 + $0x90] sm:$0xff] %v263_v27  ;;  %v270_v32 = vsel %vm268_vm7, %v269_v22, %v267_v28  ;;  %v274_v30 = vsel %vm273_vm8, %v742_v52, %v272_v29  ;;  %vm294_vm14 = vcmp.eq.f32.partialorder %v130_v14, inf  ;;  %v297_v43 = vand.u32 2147483648, %v130_v14 }
  0x3c   :  { %v370_v33 = vpop.eup %369  ;;  %318 = vst [vmem:[%s846_s2 + $0x98] sm:$0xff] %v270_v32  ;;  %v277_v35 = vsel %vm275_vm9, %v276_v26, %v274_v30  ;;  %vm296_vm15 = vcmp.eq.f32.partialorder %v130_v14, 0.0 }
  0x3d   :  { %v279_v36 = vmul.f32 %v370_v33, %v780_v2  ;;  %319 = vst [vmem:[%s846_s2 + $0xa0] sm:$0xff] %v277_v35 }
  0x3f   :  { %v372_v37 = vpop.eup %371  ;;  %v281_v39 = vsel %vm280_vm10, %v780_v2, %v279_v36 }
  0x40   :  { %v374_v31 = vpop.eup %373  ;;  %v284_v38 = vsel %vm282_vm11, %v283_v34, %v281_v39  ;;  %v286_v41 = vmul.f32 %v372_v37, %v129_v3 }
  0x41   :  { %320 = vst [vmem:[%s846_s2 + $0xa8] sm:$0xff] %v284_v38  ;;  %v293_v44 = vmul.f32 %v374_v31, %v130_v14 }
  0x42   :  { %v288_v45 = vsel %vm287_vm12, %v129_v3, %v286_v41 }
  0x43   :  { %v291_v49 = vsel %vm289_vm13, %v290_v40, %v288_v45  ;;  %v295_v50 = vsel %vm294_vm14, %v130_v14, %v293_v44 }
  0x44   :  { %321 = vst [vmem:[%s846_s2 + $0xb0] sm:$0xff] %v291_v49  ;;  %v298_v51 = vsel %vm296_vm15, %v297_v43, %v295_v50 }
  0x45   :  { %322 = vst [vmem:[%s846_s2 + $0xb8] sm:$0xff] %v298_v51 }

// kernel: a_call__.7
= control target key start
LH: loop header
LB: loop body
LE: loop exit
PB: predicated region body
PF: predicated region fallthrough
CT: control target
= control target key end

     0   :  { %s761_s9 = smov 0   ;;  %s1214_s0 = inlined_call_operand.vmem [shape: f32[768,128], index: 0, kind: input, shape index: {}]   ;;  %s1215_s1 = inlined_call_operand.vmem [shape: f32[768,128], index: 1, kind: input, shape index: {}]   ;;  %s1216_s2 = inlined_call_operand.vmem [shape: f32[768,128], index: 2, kind: output, shape index: {}]  }
   0x1 LB: > { %s653_s10 = sadd.s32 4294967295, %s744_s9   ;;  %p657_p0 = scmp.ge.s32.totalorder %s744_s9, 1  ;;  %s744_s9 = sphi %s761_s9, %s12_s9  }
   0x2   : > { %p124_p1 = scmp.lt.s32.totalorder %s744_s9, 4 }
   0x4   : > { %p125_p2 = pnand %p657_p0, %p124_p1 }
   0x5   : > { %s658_s11 = sshll.u32 (!%p125_p2), %s653_s10, 5 }
   0x6   : > { %128 = sbr.rel (%p125_p2) target bundleno = 105 (0x69), region = 28  ;;  %p152_p3 = scmp.lt.s32.totalorder (!%p125_p2), %s658_s11, 95 }
   0xd   : > { %s1218_s11 = smov (!%p152_p3, %s658_s11), 95 }
   0xe   : > { %s769_s12 = sshll.u32 %s1218_s11, 3 }
   0xf   : > { %s775_s15 = scalar_lea.vmem %s1214_s0, %s769_s12  ;;  %s781_s18 = scalar_lea.vmem %s1215_s1, %s769_s12 }
  0x10   : > { %v169_v0 = vld [vmem:[%s775_s15] sm:$0xff]  ;;  %v170_v2 = vld [vmem:[%s775_s15 + $0x8] sm:$0xff]  ;;  %v171_v7 = vld [vmem:[%s775_s15 + $0x10] sm:$0xff]  ;;  %s850_s21 = scalar_lea.vmem %s1216_s2, %s769_s12 }
  0x11   : > { %v201_v1 = vld [vmem:[%s781_s18] sm:$0xff]  ;;  %v233_v3 = vmul.f32 %v169_v0, %v169_v0  ;;  %v202_v5 = vld [vmem:[%s781_s18 + $0x8] sm:$0xff]  ;;  %v234_v6 = vmul.f32 %v170_v2, %v170_v2  ;;  %v203_v8 = vld [vmem:[%s781_s18 + $0x10] sm:$0xff]  ;;  %v235_v10 = vmul.f32 %v171_v7, %v171_v7 }
  0x12   : > { %v265_v4 = vmul.f32 %v201_v1, %v201_v1  ;;  %v266_v9 = vmul.f32 %v202_v5, %v202_v5  ;;  %v267_v11 = vmul.f32 %v203_v8, %v203_v8  ;;  %v172_v12 = vld [vmem:[%s775_s15 + $0x18] sm:$0xff]  ;;  %v173_v14 = vld [vmem:[%s775_s15 + $0x20] sm:$0xff]  ;;  %v174_v23 = vld [vmem:[%s775_s15 + $0x28] sm:$0xff] }
  0x13   : > { %v204_v13 = vld [vmem:[%s781_s18 + $0x18] sm:$0xff]  ;;  %v236_v16 = vmul.f32 %v172_v12, %v172_v12  ;;  %v205_v18 = vld [vmem:[%s781_s18 + $0x20] sm:$0xff]  ;;  %v237_v21 = vmul.f32 %v173_v14, %v173_v14  ;;  %v206_v24 = vld [vmem:[%s781_s18 + $0x28] sm:$0xff]  ;;  %v238_v29 = vmul.f32 %v174_v23, %v174_v23 }
  0x14   : > { %v792_v15 = vadd.f32 %v265_v4, %v233_v3  ;;  %v268_v17 = vmul.f32 %v204_v13, %v204_v13  ;;  %v795_v19 = vadd.f32 %v266_v9, %v234_v6  ;;  %v797_v20 = vadd.f32 %v267_v11, %v235_v10  ;;  %v175_v25 = vld [vmem:[%s775_s15 + $0x30] sm:$0xff]  ;;  %v176_v27 = vld [vmem:[%s775_s15 + $0x38] sm:$0xff]  ;;  %v177_v38 = vld [vmem:[%s775_s15 + $0x40] sm:$0xff] }
  0x15   : > { %v269_v22 = vmul.f32 %v205_v18, %v205_v18  ;;  %v207_v26 = vld [vmem:[%s781_s18 + $0x30] sm:$0xff]  ;;  %v208_v28 = vld [vmem:[%s781_s18 + $0x38] sm:$0xff]  ;;  %v270_v32 = vmul.f32 %v206_v24, %v206_v24  ;;  %v239_v33 = vmul.f32 %v175_v25, %v175_v25  ;;  %v240_v36 = vmul.f32 %v176_v27, %v176_v27  ;;  %v209_v40 = vld [vmem:[%s781_s18 + $0x40] sm:$0xff] }
  0x16   : > { %674 = vrsqrt.f32 %v792_v15  ;;  %vm331_vm0 = vcmp.eq.f32.partialorder %v792_v15, inf  ;;  %vm333_vm1 = vcmp.eq.f32.partialorder %v792_v15, 0.0  ;;  %v810_v30 = vadd.f32 %v268_v17, %v236_v16  ;;  %v178_v41 = vld [vmem:[%s775_s15 + $0x48] sm:$0xff]  ;;  %v179_v44 = vld [vmem:[%s775_s15 + $0x50] sm:$0xff]  ;;  %v180_v6 = vld [vmem:[%s775_s15 + $0x58] sm:$0xff] }
  0x17   : > { %676 = vrsqrt.f32 %v795_v19  ;;  %v812_v31 = vadd.f32 %v269_v22, %v237_v21  ;;  %v334_v34 = vand.u32 2147483648, %v792_v15  ;;  %v271_v35 = vmul.f32 %v207_v26, %v207_v26  ;;  %v210_v42 = vld [vmem:[%s781_s18 + $0x48] sm:$0xff]  ;;  %v211_v45 = vld [vmem:[%s781_s18 + $0x50] sm:$0xff]  ;;  %v212_v14 = vld [vmem:[%s781_s18 + $0x58] sm:$0xff] }
  0x18   : > { %678 = vrsqrt.f32 %v797_v20  ;;  %v272_v37 = vmul.f32 %v208_v28, %v208_v28  ;;  %vm338_vm2 = vcmp.eq.f32.partialorder %v795_v19, inf  ;;  %vm340_vm3 = vcmp.eq.f32.partialorder %v795_v19, 0.0  ;;  %v213_v18 = vld [vmem:[%s781_s18 + $0x60] sm:$0xff]  ;;  %v214_v22 = vld [vmem:[%s781_s18 + $0x68] sm:$0xff]  ;;  %v183_v23 = vld [vmem:[%s775_s15 + $0x70] sm:$0xff] }
  0x19   : > { %v341_v39 = vand.u32 2147483648, %v795_v19  ;;  %680 = vrsqrt.f32 %v810_v30  ;;  %vm345_vm4 = vcmp.eq.f32.partialorder %v797_v20, inf  ;;  %vm347_vm5 = vcmp.eq.f32.partialorder %v797_v20, 0.0 }
  0x1a   : > { %v348_v43 = vand.u32 2147483648, %v797_v20  ;;  %682 = vrsqrt.f32 %v812_v31  ;;  %v829_v46 = vadd.f32 %v270_v32, %v238_v29  ;;  %v831_v47 = vadd.f32 %v271_v35, %v239_v33  ;;  %v215_v29 = vld [vmem:[%s781_s18 + $0x70] sm:$0xff] }
  0x1b   : > { %v833_v48 = vadd.f32 %v272_v37, %v240_v36  ;;  %v241_v49 = vmul.f32 %v177_v38, %v177_v38  ;;  %vm352_vm6 = vcmp.eq.f32.partialorder %v810_v30, inf  ;;  %v273_v50 = vmul.f32 %v209_v40, %v209_v40 }
  0x1c   : > { %v242_v51 = vmul.f32 %v178_v41, %v178_v41  ;;  %v274_v52 = vmul.f32 %v210_v42, %v210_v42  ;;  %vm354_vm7 = vcmp.eq.f32.partialorder %v810_v30, 0.0  ;;  %684 = vrsqrt.f32 %v829_v46 }
  0x1d   : > { %v243_v53 = vmul.f32 %v179_v44, %v179_v44  ;;  %v275_v54 = vmul.f32 %v211_v45, %v211_v45  ;;  %v355_v56 = vand.u32 2147483648, %v810_v30  ;;  %vm359_vm8 = vcmp.eq.f32.partialorder %v812_v31, inf }
  0x1e   : > { %vm361_vm9 = vcmp.eq.f32.partialorder %v812_v31, 0.0  ;;  %686 = vrsqrt.f32 %v831_v47  ;;  %v362_v59 = vand.u32 2147483648, %v812_v31  ;;  %vm366_vm10 = vcmp.eq.f32.partialorder %v829_v46, inf }
  0x1f   : > { %688 = vrsqrt.f32 %v833_v48  ;;  %vm368_vm11 = vcmp.eq.f32.partialorder %v829_v46, 0.0  ;;  %v854_v62 = vadd.f32 %v273_v50, %v241_v49  ;;  %v856_v63 = vadd.f32 %v274_v52, %v242_v51 }
  0x20   : > { %v675_v55 = vpop.eup %674  ;;  %v369_v2 = vand.u32 2147483648, %v829_v46  ;;  %v863_v3 = vadd.f32 %v275_v54, %v243_v53  ;;  %vm373_vm12 = vcmp.eq.f32.partialorder %v831_v47, inf  ;;  %vm375_vm13 = vcmp.eq.f32.partialorder %v831_v47, 0.0  ;;  %v216_v53 = vld [vmem:[%s781_s18 + $0x78] sm:$0xff] }
  0x21   : > { %v677_v57 = vpop.eup %676  ;;  %v330_v58 = vmul.f32 %v675_v55, %v792_v15  ;;  %690 = vrsqrt.f32 %v854_v62  ;;  %v376_v10 = vand.u32 2147483648, %v831_v47  ;;  %vm380_vm14 = vcmp.eq.f32.partialorder %v833_v48, inf }
  0x22   : > { %v679_v60 = vpop.eup %678  ;;  %v337_v61 = vmul.f32 %v677_v57, %v795_v19  ;;  %692 = vrsqrt.f32 %v856_v63  ;;  %vm382_vm15 = vcmp.eq.f32.partialorder %v833_v48, 0.0  ;;  %v244_v17 = vmul.f32 %v180_v6, %v180_v6 }
  0x23   : > { %v332_v0 = vsel %vm331_vm0, %v792_v15, %v330_v58  ;;  %v344_v1 = vmul.f32 %v679_v60, %v797_v20  ;;  %v681_v7 = vpop.eup %680  ;;  %v181_v15 = vld [vmem:[%s775_s15 + $0x60] sm:$0xff]  ;;  %694 = vrsqrt.f32 %v863_v3  ;;  %v383_v21 = vand.u32 2147483648, %v833_v48 }
  0x24   : > { %v335_v4 = vsel %vm333_vm1, %v334_v34, %v332_v0  ;;  %v339_v5 = vsel %vm338_vm2, %v795_v19, %v337_v61  ;;  %v683_v11 = vpop.eup %682  ;;  %v351_v13 = vmul.f32 %v681_v7, %v810_v30  ;;  %v182_v19 = vld [vmem:[%s775_s15 + $0x68] sm:$0xff]  ;;  %vm387_vm0 = vcmp.eq.f32.partialorder %v854_v62, inf }
  0x25   : > { %553 = vst [vmem:[%s850_s21] sm:$0xff] %v335_v4  ;;  %v342_v8 = vsel %vm340_vm3, %v341_v39, %v339_v5  ;;  %v346_v9 = vsel %vm345_vm4, %v797_v20, %v344_v1  ;;  %v358_v16 = vmul.f32 %v683_v11, %v812_v31  ;;  %vm389_vm1 = vcmp.eq.f32.partialorder %v854_v62, 0.0  ;;  %v185_v5 = vld [vmem:[%s775_s15 + $0x80] sm:$0xff]  ;;  %v186_v7 = vld [vmem:[%s775_s15 + $0x88] sm:$0xff] }
  0x26   : > { %554 = vst [vmem:[%s850_s21 + $0x8] sm:$0xff] %v342_v8  ;;  %v349_v12 = vsel %vm347_vm5, %v348_v43, %v346_v9  ;;  %v353_v20 = vsel %vm352_vm6, %v810_v30, %v351_v13  ;;  %v685_v24 = vpop.eup %684  ;;  %v276_v27 = vmul.f32 %v212_v14, %v212_v14  ;;  %v245_v28 = vmul.f32 %v181_v15, %v181_v15  ;;  %v218_v8 = vld [vmem:[%s781_s18 + $0x88] sm:$0xff]  ;;  %v219_v15 = vld [vmem:[%s781_s18 + $0x90] sm:$0xff] }
  0x27   : > { %555 = vst [vmem:[%s850_s21 + $0x10] sm:$0xff] %v349_v12  ;;  %v356_v25 = vsel %vm354_vm7, %v355_v56, %v353_v20  ;;  %v360_v26 = vsel %vm359_vm8, %v812_v31, %v358_v16  ;;  %v365_v34 = vmul.f32 %v685_v24, %v829_v46  ;;  %v277_v35 = vmul.f32 %v213_v18, %v213_v18  ;;  %v188_v18 = vld [vmem:[%s775_s15 + $0x98] sm:$0xff]  ;;  %v189_v20 = vld [vmem:[%s775_s15 + $0xa0] sm:$0xff] }
  0x28   : > { %v687_v32 = vpop.eup %686  ;;  %556 = vst [vmem:[%s850_s21 + $0x18] sm:$0xff] %v356_v25  ;;  %v363_v33 = vsel %vm361_vm9, %v362_v59, %v360_v26  ;;  %v246_v36 = vmul.f32 %v182_v19, %v182_v19  ;;  %v915_v38 = vadd.f32 %v276_v27, %v244_v17  ;;  %v278_v39 = vmul.f32 %v214_v22, %v214_v22  ;;  %v220_v19 = vld [vmem:[%s781_s18 + $0x98] sm:$0xff] }
  0x29   : > { %v689_v37 = vpop.eup %688  ;;  %557 = vst [vmem:[%s850_s21 + $0x20] sm:$0xff] %v363_v33  ;;  %v372_v30 = vmul.f32 %v687_v32, %v831_v47  ;;  %v247_v40 = vmul.f32 %v183_v23, %v183_v23  ;;  %v367_v31 = vsel %vm366_vm10, %v829_v46, %v365_v34  ;;  %v921_v42 = vadd.f32 %v277_v35, %v245_v28  ;;  %v184_v46 = vld [vmem:[%s775_s15 + $0x78] sm:$0xff]  ;;  %v221_v23 = vld [vmem:[%s781_s18 + $0xa0] sm:$0xff] }
  0x2a   : > { %v379_v41 = vmul.f32 %v689_v37, %v833_v48  ;;  %v279_v43 = vmul.f32 %v215_v29, %v215_v29  ;;  %v370_v44 = vsel %vm368_vm11, %v369_v2, %v367_v31  ;;  %v390_v49 = vand.u32 2147483648, %v854_v62 }
  0x2b   : > { %v374_v45 = vsel %vm373_vm12, %v831_v47, %v372_v30  ;;  %696 = vrsqrt.f32 %v915_v38  ;;  %v691_v50 = vpop.eup %690  ;;  %558 = vst [vmem:[%s850_s21 + $0x28] sm:$0xff] %v370_v44  ;;  %vm394_vm2 = vcmp.eq.f32.partialorder %v856_v63, inf  ;;  %vm396_vm3 = vcmp.eq.f32.partialorder %v856_v63, 0.0 }
  0x2c   : > { %v377_v51 = vsel %vm375_vm13, %v376_v10, %v374_v45  ;;  %v381_v52 = vsel %vm380_vm14, %v833_v48, %v379_v41  ;;  %v386_v55 = vmul.f32 %v691_v50, %v854_v62  ;;  %v397_v56 = vand.u32 2147483648, %v856_v63  ;;  %v693_v47 = vpop.eup %692  ;;  %v190_v41 = vld [vmem:[%s775_s15 + $0xa8] sm:$0xff] }
  0x2d   : > { %559 = vst [vmem:[%s850_s21 + $0x30] sm:$0xff] %v377_v51  ;;  %v384_v54 = vsel %vm382_vm15, %v383_v21, %v381_v52  ;;  %698 = vrsqrt.f32 %v921_v42  ;;  %vm401_vm4 = vcmp.eq.f32.partialorder %v863_v3, inf  ;;  %v404_v57 = vand.u32 2147483648, %v863_v3  ;;  %v695_v59 = vpop.eup %694 }
  0x2e   : > { %560 = vst [vmem:[%s850_s21 + $0x38] sm:$0xff] %v384_v54  ;;  %v949_v58 = vadd.f32 %v278_v39, %v246_v36  ;;  %v951_v48 = vadd.f32 %v279_v43, %v247_v40  ;;  %v388_v60 = vsel %vm387_vm0, %v854_v62, %v386_v55  ;;  %v393_v61 = vmul.f32 %v693_v47, %v856_v63  ;;  %v217_v62 = vld [vmem:[%s781_s18 + $0x80] sm:$0xff]  ;;  %v222_v43 = vld [vmem:[%s781_s18 + $0xa8] sm:$0xff] }
  0x2f   : > { %v248_v0 = vmul.f32 %v184_v46, %v184_v46  ;;  %v280_v1 = vmul.f32 %v216_v53, %v216_v53  ;;  %v391_v2 = vsel %vm389_vm1, %v390_v49, %v388_v60  ;;  %v400_v4 = vmul.f32 %v695_v59, %v863_v3  ;;  %v223_v59 = vld [vmem:[%s781_s18 + $0xb0] sm:$0xff] }
  0x30   : > { %vm403_vm5 = vcmp.eq.f32.partialorder %v863_v3, 0.0  ;;  %700 = vrsqrt.f32 %v949_v58  ;;  %561 = vst [vmem:[%s850_s21 + $0x40] sm:$0xff] %v391_v2  ;;  %v395_v6 = vsel %vm394_vm2, %v856_v63, %v393_v61  ;;  %vm408_vm6 = vcmp.eq.f32.partialorder %v915_v38, inf  ;;  %v187_v63 = vld [vmem:[%s775_s15 + $0x90] sm:$0xff] }
  0x31   : > { %702 = vrsqrt.f32 %v951_v48  ;;  %v398_v9 = vsel %vm396_vm3, %v397_v56, %v395_v6  ;;  %v402_v10 = vsel %vm401_vm4, %v863_v3, %v400_v4  ;;  %vm410_vm7 = vcmp.eq.f32.partialorder %v915_v38, 0.0 }
  0x32   : > { %562 = vst [vmem:[%s850_s21 + $0x48] sm:$0xff] %v398_v9  ;;  %v405_v11 = vsel %vm403_vm5, %v404_v57, %v402_v10  ;;  %v411_v12 = vand.u32 2147483648, %v915_v38  ;;  %v980_v13 = vadd.f32 %v280_v1, %v248_v0  ;;  %v249_v14 = vmul.f32 %v185_v5, %v185_v5  ;;  %v191_v57 = vld [vmem:[%s775_s15 + $0xb0] sm:$0xff]  ;;  %v192_v0 = vld [vmem:[%s775_s15 + $0xb8] sm:$0xff]  ;;  %v193_v10 = vld [vmem:[%s775_s15 + $0xc0] sm:$0xff] }
  0x33   : > { %563 = vst [vmem:[%s850_s21 + $0x50] sm:$0xff] %v405_v11  ;;  %vm415_vm8 = vcmp.eq.f32.partialorder %v921_v42, inf  ;;  %v281_v3 = vmul.f32 %v217_v62, %v217_v62  ;;  %v250_v16 = vmul.f32 %v186_v7, %v186_v7  ;;  %v282_v17 = vmul.f32 %v218_v8, %v218_v8  ;;  %v224_v1 = vld [vmem:[%s781_s18 + $0xb8] sm:$0xff]  ;;  %v225_v11 = vld [vmem:[%s781_s18 + $0xc0] sm:$0xff] }
  0x34   : > { %vm417_vm9 = vcmp.eq.f32.partialorder %v921_v42, 0.0  ;;  %v418_v22 = vand.u32 2147483648, %v921_v42  ;;  %vm422_vm10 = vcmp.eq.f32.partialorder %v949_v58, inf  ;;  %704 = vrsqrt.f32 %v980_v13 }
  0x35   : > { %v697_v21 = vpop.eup %696  ;;  %v995_v25 = vadd.f32 %v281_v3, %v249_v14  ;;  %v997_v26 = vadd.f32 %v282_v17, %v250_v16  ;;  %v251_v27 = vmul.f32 %v187_v63, %v187_v63  ;;  %v283_v29 = vmul.f32 %v219_v15, %v219_v15 }
  0x36   : > { %v407_v24 = vmul.f32 %v697_v21, %v915_v38  ;;  %v252_v32 = vmul.f32 %v188_v18, %v188_v18  ;;  %v284_v33 = vmul.f32 %v220_v19, %v220_v19  ;;  %v253_v34 = vmul.f32 %v189_v20, %v189_v20  ;;  %v194_v20 = vld [vmem:[%s775_s15 + $0xc8] sm:$0xff] }
  0x37   : > { %v699_v28 = vpop.eup %698  ;;  %706 = vrsqrt.f32 %v995_v25  ;;  %v285_v37 = vmul.f32 %v221_v23, %v221_v23  ;;  %vm424_vm11 = vcmp.eq.f32.partialorder %v949_v58, 0.0  ;;  %v425_v39 = vand.u32 2147483648, %v949_v58  ;;  %v226_v23 = vld [vmem:[%s781_s18 + $0xc8] sm:$0xff] }
  0x38   : > { %v409_v35 = vsel %vm408_vm6, %v915_v38, %v407_v24  ;;  %v414_v36 = vmul.f32 %v699_v28, %v921_v42  ;;  %708 = vrsqrt.f32 %v997_v26  ;;  %vm429_vm12 = vcmp.eq.f32.partialorder %v951_v48, inf  ;;  %v195_v24 = vld [vmem:[%s775_s15 + $0xd0] sm:$0xff] }
  0x39   : > { %v412_v30 = vsel %vm410_vm7, %v411_v12, %v409_v35  ;;  %vm431_vm13 = vcmp.eq.f32.partialorder %v951_v48, 0.0  ;;  %v432_v38 = vand.u32 2147483648, %v951_v48  ;;  %v1021_v50 = vadd.f32 %v283_v29, %v251_v27 }
  0x3a   : > { %v701_v40 = vpop.eup %700  ;;  %564 = vst [vmem:[%s850_s21 + $0x58] sm:$0xff] %v412_v30  ;;  %v416_v31 = vsel %vm415_vm8, %v921_v42, %v414_v36  ;;  %v1023_v51 = vadd.f32 %v284_v33, %v252_v32  ;;  %vm436_vm14 = vcmp.eq.f32.partialorder %v980_v13, inf  ;;  %vm438_vm15 = vcmp.eq.f32.partialorder %v980_v13, 0.0  ;;  %v196_v32 = vld [vmem:[%s775_s15 + $0xd8] sm:$0xff] }
  0x3b   : > { %v703_v44 = vpop.eup %702  ;;  %v419_v45 = vsel %vm417_vm9, %v418_v22, %v416_v31  ;;  %v421_v49 = vmul.f32 %v701_v40, %v949_v58  ;;  %v1029_v46 = vadd.f32 %v285_v37, %v253_v34  ;;  %710 = vrsqrt.f32 %v1021_v50  ;;  %v228_v33 = vld [vmem:[%s781_s18 + $0xd8] sm:$0xff] }
  0x3c   : > { %565 = vst [vmem:[%s850_s21 + $0x60] sm:$0xff] %v419_v45  ;;  %v428_v52 = vmul.f32 %v703_v44, %v951_v48  ;;  %v254_v53 = vmul.f32 %v190_v41, %v190_v41  ;;  %v286_v54 = vmul.f32 %v222_v43, %v222_v43  ;;  %v439_v47 = vand.u32 2147483648, %v980_v13 }
  0x3d   : > { %v423_v42 = vsel %vm422_vm10, %v949_v58, %v421_v49  ;;  %712 = vrsqrt.f32 %v1023_v51  ;;  %vm443_vm0 = vcmp.eq.f32.partialorder %v995_v25, inf  ;;  %vm445_vm1 = vcmp.eq.f32.partialorder %v995_v25, 0.0 }
  0x3e   : > { %v426_v55 = vsel %vm424_vm11, %v425_v39, %v423_v42  ;;  %v430_v56 = vsel %vm429_vm12, %v951_v48, %v428_v52  ;;  %v705_v60 = vpop.eup %704  ;;  %v446_v58 = vand.u32 2147483648, %v995_v25  ;;  %vm450_vm2 = vcmp.eq.f32.partialorder %v997_v26, inf }
  0x3f   : > { %566 = vst [vmem:[%s850_s21 + $0x68] sm:$0xff] %v426_v55  ;;  %v433_v61 = vsel %vm431_vm13, %v432_v38, %v430_v56  ;;  %v435_v2 = vmul.f32 %v705_v60, %v980_v13  ;;  %vm452_vm3 = vcmp.eq.f32.partialorder %v997_v26, 0.0  ;;  %714 = vrsqrt.f32 %v1029_v46 }
  0x40   : > { %567 = vst [vmem:[%s850_s21 + $0x70] sm:$0xff] %v433_v61  ;;  %v453_v48 = vand.u32 2147483648, %v997_v26  ;;  %v1058_v4 = vadd.f32 %v286_v54, %v254_v53  ;;  %v255_v5 = vmul.f32 %v191_v57, %v191_v57  ;;  %v287_v6 = vmul.f32 %v223_v59, %v223_v59  ;;  %v197_v54 = vld [vmem:[%s775_s15 + $0xe0] sm:$0xff] }
  0x41   : > { %v707_v62 = vpop.eup %706  ;;  %v437_v7 = vsel %vm436_vm14, %v980_v13, %v435_v2  ;;  %vm457_vm4 = vcmp.eq.f32.partialorder %v1021_v50, inf  ;;  %v256_v8 = vmul.f32 %v192_v0, %v192_v0  ;;  %v288_v9 = vmul.f32 %v224_v1, %v224_v1  ;;  %v198_v2 = vld [vmem:[%s775_s15 + $0xe8] sm:$0xff] }
  0x42   : > { %v709_v12 = vpop.eup %708  ;;  %v440_v14 = vsel %vm438_vm15, %v439_v47, %v437_v7  ;;  %v442_v63 = vmul.f32 %v707_v62, %v995_v25  ;;  %vm459_vm5 = vcmp.eq.f32.partialorder %v1021_v50, 0.0  ;;  %716 = vrsqrt.f32 %v1058_v4 }
  0x43   : > { %568 = vst [vmem:[%s850_s21 + $0x78] sm:$0xff] %v440_v14  ;;  %v449_v15 = vmul.f32 %v709_v12, %v997_v26  ;;  %v460_v3 = vand.u32 2147483648, %v1021_v50  ;;  %vm464_vm6 = vcmp.eq.f32.partialorder %v1023_v51, inf  ;;  %v1075_v16 = vadd.f32 %v287_v6, %v255_v5 }
  0x44   : > { %v444_v13 = vsel %vm443_vm0, %v995_v25, %v442_v63  ;;  %v1080_v17 = vadd.f32 %v288_v9, %v256_v8  ;;  %v257_v18 = vmul.f32 %v193_v10, %v193_v10  ;;  %v289_v19 = vmul.f32 %v225_v11, %v225_v11  ;;  %v227_v25 = vld [vmem:[%s781_s18 + $0xd0] sm:$0xff] }
  0x45   : > { %v447_v21 = vsel %vm445_vm1, %v446_v58, %v444_v13  ;;  %v451_v22 = vsel %vm450_vm2, %v997_v26, %v449_v15  ;;  %vm466_vm7 = vcmp.eq.f32.partialorder %v1023_v51, 0.0  ;;  %718 = vrsqrt.f32 %v1075_v16  ;;  %v711_v27 = vpop.eup %710  ;;  %v199_v8 = vld [vmem:[%s775_s15 + $0xf0] sm:$0xff] }
  0x46   : > { %569 = vst [vmem:[%s850_s21 + $0x80] sm:$0xff] %v447_v21  ;;  %v454_v28 = vsel %vm452_vm3, %v453_v48, %v451_v22  ;;  %v467_v29 = vand.u32 2147483648, %v1023_v51  ;;  %vm471_vm8 = vcmp.eq.f32.partialorder %v1029_v46, inf  ;;  %720 = vrsqrt.f32 %v1080_v17  ;;  %v230_v48 = vld [vmem:[%s781_s18 + $0xe8] sm:$0xff] }
  0x47   : > { %v713_v34 = vpop.eup %712  ;;  %570 = vst [vmem:[%s850_s21 + $0x88] sm:$0xff] %v454_v28  ;;  %v456_v35 = vmul.f32 %v711_v27, %v1021_v50  ;;  %vm473_vm9 = vcmp.eq.f32.partialorder %v1029_v46, 0.0  ;;  %v474_v36 = vand.u32 2147483648, %v1029_v46  ;;  %v258_v26 = vmul.f32 %v194_v20, %v194_v20 }
  0x48   : > { %v463_v37 = vmul.f32 %v713_v34, %v1023_v51  ;;  %v1106_v30 = vadd.f32 %v289_v19, %v257_v18  ;;  %v290_v39 = vmul.f32 %v226_v23, %v226_v23  ;;  %v259_v40 = vmul.f32 %v195_v24, %v195_v24  ;;  %v200_v18 = vld [vmem:[%s775_s15 + $0xf8] sm:$0xff] }
  0x49   : > { %v715_v31 = vpop.eup %714  ;;  %v458_v38 = vsel %vm457_vm4, %v1021_v50, %v456_v35  ;;  %v291_v41 = vmul.f32 %v227_v25, %v227_v25  ;;  %v260_v43 = vmul.f32 %v196_v32, %v196_v32  ;;  %v292_v44 = vmul.f32 %v228_v33, %v228_v33  ;;  %v229_v50 = vld [vmem:[%s781_s18 + $0xe0] sm:$0xff]  ;;  %v232_v19 = vld [vmem:[%s781_s18 + $0xf8] sm:$0xff] }
  0x4a   : > { %v461_v45 = vsel %vm459_vm5, %v460_v3, %v458_v38  ;;  %v465_v49 = vsel %vm464_vm6, %v1023_v51, %v463_v37  ;;  %v470_v52 = vmul.f32 %v715_v31, %v1029_v46  ;;  %722 = vrsqrt.f32 %v1106_v30 }
  0x4b   : > { %571 = vst [vmem:[%s850_s21 + $0x90] sm:$0xff] %v461_v45  ;;  %v468_v42 = vsel %vm466_vm7, %v467_v29, %v465_v49  ;;  %vm478_vm10 = vcmp.eq.f32.partialorder %v1058_v4, inf  ;;  %v481_v53 = vand.u32 2147483648, %v1058_v4  ;;  %v1129_v47 = vadd.f32 %v290_v39, %v258_v26 }
  0x4c   : > { %v717_v55 = vpop.eup %716  ;;  %572 = vst [vmem:[%s850_s21 + $0x98] sm:$0xff] %v468_v42  ;;  %v472_v56 = vsel %vm471_vm8, %v1029_v46, %v470_v52  ;;  %v1131_v57 = vadd.f32 %v291_v41, %v259_v40  ;;  %v1133_v51 = vadd.f32 %v292_v44, %v260_v43  ;;  %vm480_vm11 = vcmp.eq.f32.partialorder %v1058_v4, 0.0 }
  0x4d   : > { %v475_v59 = vsel %vm473_vm9, %v474_v36, %v472_v56  ;;  %v477_v60 = vmul.f32 %v717_v55, %v1058_v4  ;;  %vm485_vm12 = vcmp.eq.f32.partialorder %v1075_v16, inf  ;;  %vm487_vm13 = vcmp.eq.f32.partialorder %v1075_v16, 0.0 }
  0x4e   : > { %573 = vst [vmem:[%s850_s21 + $0xa0] sm:$0xff] %v475_v59  ;;  %724 = vrsqrt.f32 %v1129_v47  ;;  %v261_v61 = vmul.f32 %v197_v54, %v197_v54  ;;  %v293_v58 = vmul.f32 %v229_v50, %v229_v50  ;;  %v488_v1 = vand.u32 2147483648, %v1075_v16 }
  0x4f   : > { %v719_v0 = vpop.eup %718  ;;  %v479_v46 = vsel %vm478_vm10, %v1058_v4, %v477_v60  ;;  %vm492_vm14 = vcmp.eq.f32.partialorder %v1080_v17, inf  ;;  %726 = vrsqrt.f32 %v1131_v57  ;;  %v495_v7 = vand.u32 2147483648, %v1080_v17  ;;  %v231_v4 = vld [vmem:[%s781_s18 + $0xf0] sm:$0xff] }
  0x50   : > { %v721_v5 = vpop.eup %720  ;;  %v482_v6 = vsel %vm480_vm11, %v481_v53, %v479_v46  ;;  %v484_v62 = vmul.f32 %v719_v0, %v1075_v16  ;;  %728 = vrsqrt.f32 %v1133_v51  ;;  %vm494_vm15 = vcmp.eq.f32.partialorder %v1080_v17, 0.0 }
  0x51   : > { %574 = vst [vmem:[%s850_s21 + $0xa8] sm:$0xff] %v482_v6  ;;  %v491_v9 = vmul.f32 %v721_v5, %v1080_v17  ;;  %v1162_v11 = vadd.f32 %v293_v58, %v261_v61  ;;  %v262_v12 = vmul.f32 %v198_v2, %v198_v2  ;;  %v294_v14 = vmul.f32 %v230_v48, %v230_v48 }
  0x52   : > { %v486_v10 = vsel %vm485_vm12, %v1075_v16, %v484_v62  ;;  %v263_v3 = vmul.f32 %v199_v8, %v199_v8  ;;  %v295_v13 = vmul.f32 %v231_v4, %v231_v4  ;;  %vm499_vm0 = vcmp.eq.f32.partialorder %v1106_v30, inf }
  0x53   : > { %v489_v63 = vsel %vm487_vm13, %v488_v1, %v486_v10  ;;  %v493_v15 = vsel %vm492_vm14, %v1080_v17, %v491_v9  ;;  %v502_v22 = vand.u32 2147483648, %v1106_v30  ;;  %730 = vrsqrt.f32 %v1162_v11 }
  0x54   : > { %v723_v20 = vpop.eup %722  ;;  %575 = vst [vmem:[%s850_s21 + $0xb0] sm:$0xff] %v489_v63  ;;  %v496_v21 = vsel %vm494_vm15, %v495_v7, %v493_v15  ;;  %vm501_vm1 = vcmp.eq.f32.partialorder %v1106_v30, 0.0  ;;  %v326_v17 = vadd.f32 %v294_v14, %v262_v12  ;;  %v327_v23 = vadd.f32 %v295_v13, %v263_v3 }
  0x55   : > { %576 = vst [vmem:[%s850_s21 + $0xb8] sm:$0xff] %v496_v21  ;;  %v498_v16 = vmul.f32 %v723_v20, %v1106_v30  ;;  %v264_v24 = vmul.f32 %v200_v18, %v200_v18  ;;  %v296_v27 = vmul.f32 %v232_v19, %v232_v19  ;;  %vm506_vm2 = vcmp.eq.f32.partialorder %v1129_v47, inf }
  0x56   : > { %732 = vrsqrt.f32 %v326_v17  ;;  %vm508_vm3 = vcmp.eq.f32.partialorder %v1129_v47, 0.0  ;;  %v509_v32 = vand.u32 2147483648, %v1129_v47  ;;  %vm513_vm4 = vcmp.eq.f32.partialorder %v1131_v57, inf }
  0x57   : > { %v500_v28 = vsel %vm499_vm0, %v1106_v30, %v498_v16  ;;  %734 = vrsqrt.f32 %v327_v23  ;;  %v516_v35 = vand.u32 2147483648, %v1131_v57  ;;  %v328_v36 = vadd.f32 %v296_v27, %v264_v24 }
  0x58   : > { %v725_v29 = vpop.eup %724  ;;  %v503_v25 = vsel %vm501_vm1, %v502_v22, %v500_v28  ;;  %vm515_vm5 = vcmp.eq.f32.partialorder %v1131_v57, 0.0  ;;  %vm520_vm6 = vcmp.eq.f32.partialorder %v1133_v51, inf  ;;  %v523_v30 = vand.u32 2147483648, %v1133_v51 }
  0x59   : > { %v727_v33 = vpop.eup %726  ;;  %577 = vst [vmem:[%s850_s21 + $0xc0] sm:$0xff] %v503_v25  ;;  %v505_v34 = vmul.f32 %v725_v29, %v1129_v47  ;;  %vm522_vm7 = vcmp.eq.f32.partialorder %v1133_v51, 0.0  ;;  %736 = vrsqrt.f32 %v328_v36  ;;  %vm527_vm8 = vcmp.eq.f32.partialorder %v1162_v11, inf }
  0x5a   : > { %v729_v26 = vpop.eup %728  ;;  %v512_v37 = vmul.f32 %v727_v33, %v1131_v57  ;;  %v530_v49 = vand.u32 2147483648, %v1162_v11  ;;  %vm529_vm9 = vcmp.eq.f32.partialorder %v1162_v11, 0.0  ;;  %vm534_vm10 = vcmp.eq.f32.partialorder %v326_v17, inf }
  0x5b   : > { %v507_v39 = vsel %vm506_vm2, %v1129_v47, %v505_v34  ;;  %v519_v40 = vmul.f32 %v729_v26, %v1133_v51  ;;  %vm536_vm11 = vcmp.eq.f32.partialorder %v326_v17, 0.0  ;;  %v537_v54 = vand.u32 2147483648, %v326_v17 }
  0x5c   : > { %v510_v31 = vsel %vm508_vm3, %v509_v32, %v507_v39  ;;  %v514_v38 = vsel %vm513_vm4, %v1131_v57, %v512_v37  ;;  %vm541_vm12 = vcmp.eq.f32.partialorder %v327_v23, inf  ;;  %v544_v47 = vand.u32 2147483648, %v327_v23 }
  0x5d   : > { %578 = vst [vmem:[%s850_s21 + $0xc8] sm:$0xff] %v510_v31  ;;  %v517_v41 = vsel %vm515_vm5, %v516_v35, %v514_v38  ;;  %v521_v43 = vsel %vm520_vm6, %v1133_v51, %v519_v40  ;;  %v731_v44 = vpop.eup %730  ;;  %vm543_vm13 = vcmp.eq.f32.partialorder %v327_v23, 0.0  ;;  %vm548_vm14 = vcmp.eq.f32.partialorder %v328_v36, inf }
  0x5e   : > { %579 = vst [vmem:[%s850_s21 + $0xd0] sm:$0xff] %v517_v41  ;;  %v524_v45 = vsel %vm522_vm7, %v523_v30, %v521_v43  ;;  %v526_v52 = vmul.f32 %v731_v44, %v1162_v11  ;;  %v551_v58 = vand.u32 2147483648, %v328_v36  ;;  %vm550_vm15 = vcmp.eq.f32.partialorder %v328_v36, 0.0 }
  0x5f   : > { %580 = vst [vmem:[%s850_s21 + $0xd8] sm:$0xff] %v524_v45 }
  0x60   : > { %v733_v42 = vpop.eup %732  ;;  %v528_v53 = vsel %vm527_vm8, %v1162_v11, %v526_v52 }
  0x61   : > { %v735_v50 = vpop.eup %734  ;;  %v531_v55 = vsel %vm529_vm9, %v530_v49, %v528_v53  ;;  %v533_v56 = vmul.f32 %v733_v42, %v326_v17 }
  0x62   : > { %581 = vst [vmem:[%s850_s21 + $0xe0] sm:$0xff] %v531_v55  ;;  %v540_v57 = vmul.f32 %v735_v50, %v327_v23 }
  0x63   : > { %v535_v51 = vsel %vm534_vm10, %v326_v17, %v533_v56  ;;  %v737_v59 = vpop.eup %736 }
  0x64   : > { %v538_v60 = vsel %vm536_vm11, %v537_v54, %v535_v51  ;;  %v542_v61 = vsel %vm541_vm12, %v327_v23, %v540_v57  ;;  %v547_v46 = vmul.f32 %v737_v59, %v328_v36 }
  0x65   : > { %582 = vst [vmem:[%s850_s21 + $0xe8] sm:$0xff] %v538_v60  ;;  %v545_v0 = vsel %vm543_vm13, %v544_v47, %v542_v61 }
  0x66   : > { %583 = vst [vmem:[%s850_s21 + $0xf0] sm:$0xff] %v545_v0  ;;  %v549_v1 = vsel %vm548_vm14, %v328_v36, %v547_v46 }
  0x67   : > { %v552_v2 = vsel %vm550_vm15, %v551_v58, %v549_v1 }
  0x68   : > { %584 = vst [vmem:[%s850_s21 + $0xf8] sm:$0xff] %v552_v2 }
  0x69 PF: > { %s12_s9 = sadd.s32 1, %s744_s9  }
  0x6a   : > { %p9_p4 = scmp.ge.s32.totalorder %s12_s9, 5  }
  0x6c   :  { %11 = sbr.rel (!%p9_p4) target bundleno = 1 (0x1), region = 61 }

// kernel: a_call__.8
= control target key start
LH: loop header
LB: loop body
LE: loop exit
PB: predicated region body
PF: predicated region fallthrough
CT: control target
= control target key end

     0   :  { %vm507_vm0 = vcmask 130048   ;;  %vm568_vm1 = vcmask 128000   ;;  %s1216_s1 = inlined_call_operand.vmem [shape: f32[16,256], index: 1, kind: input, shape index: {}]   ;;  %s1217_s0 = inlined_call_operand.vmem [shape: f32[486,256], index: 0, kind: input, shape index: {}]   ;;  %s1218_s2 = inlined_call_operand.vmem [shape: f32[486,16], index: 2, kind: output, shape index: {}]  }
   0x1   :  { %v134_v0 = vld [vmem:[%s1216_s1 + $0x8] sm:$0xff]  ;;  %v136_v1 = vld [vmem:[%s1216_s1 + $0x18] sm:$0xff]  ;;  %v133_v2 = vld [vmem:[%s1216_s1] sm:$0xff] }
   0x2   :  { %v574_v3 = vpack.c.bf16 %v136_v1, %v134_v0  ;;  %v135_v4 = vld [vmem:[%s1216_s1 + $0x10] sm:$0xff]  ;;  %v12_v5 = vld [vmem:[%s1217_s0 + $0x8] sm:$0xff]  ;;  %v74_v7 = vld [vmem:[%s1217_s0 + $0x1f8] sm:$0xff] }
   0x3   :  { %v576_v6 = vpack.c.bf16 %v135_v4, %v133_v2  ;;  %201 = vmatprep.mubr.f32.mxu0 %v12_v5  ;;  %356 = vmatprep.mubr.f32.mxu1 %v74_v7  ;;  %v11_v8 = vld [vmem:[%s1217_s0] sm:$0xff]  ;;  %v73_v9 = vld [vmem:[%s1217_s0 + $0x1f0] sm:$0xff]  ;;  %v14_v10 = vld [vmem:[%s1217_s0 + $0x18] sm:$0xff] }
   0x4   :  { %575 = vmatprep.subr.bf16.mxu0 %v574_v3  ;;  %578 = vmatprep.subr.bf16.mxu1 %v574_v3  ;;  %v76_v11 = vld [vmem:[%s1217_s0 + $0x208] sm:$0xff]  ;;  %v13_v12 = vld [vmem:[%s1217_s0 + $0x10] sm:$0xff]  ;;  %v75_v13 = vld [vmem:[%s1217_s0 + $0x200] sm:$0xff] }
   0x5   :  { %577 = vmatpush1.bf16.xpose.msra.mxu0 %v576_v6  ;;  %579 = vmatpush1.bf16.xpose.msra.mxu1 %v576_v6  ;;  %v16_v14 = vld [vmem:[%s1217_s0 + $0x28] sm:$0xff]  ;;  %v78_v15 = vld [vmem:[%s1217_s0 + $0x218] sm:$0xff]  ;;  %v15_v16 = vld [vmem:[%s1217_s0 + $0x20] sm:$0xff] }
   0x6   :  { %v77_v17 = vld [vmem:[%s1217_s0 + $0x210] sm:$0xff]  ;;  %v18_v18 = vld [vmem:[%s1217_s0 + $0x38] sm:$0xff]  ;;  %v80_v19 = vld [vmem:[%s1217_s0 + $0x228] sm:$0xff] }
   0x7   :  { %v17_v20 = vld [vmem:[%s1217_s0 + $0x30] sm:$0xff]  ;;  %v79_v21 = vld [vmem:[%s1217_s0 + $0x220] sm:$0xff]  ;;  %v20_v22 = vld [vmem:[%s1217_s0 + $0x48] sm:$0xff] }
   0x8   :  { %v82_v23 = vld [vmem:[%s1217_s0 + $0x238] sm:$0xff]  ;;  %v19_v24 = vld [vmem:[%s1217_s0 + $0x40] sm:$0xff]  ;;  %v81_v25 = vld [vmem:[%s1217_s0 + $0x230] sm:$0xff] }
   0x9   :  { %v22_v26 = vld [vmem:[%s1217_s0 + $0x58] sm:$0xff]  ;;  %v84_v27 = vld [vmem:[%s1217_s0 + $0x248] sm:$0xff]  ;;  %v21_v28 = vld [vmem:[%s1217_s0 + $0x50] sm:$0xff] }
   0xa   :  { %v83_v29 = vld [vmem:[%s1217_s0 + $0x240] sm:$0xff]  ;;  %v24_v30 = vld [vmem:[%s1217_s0 + $0x68] sm:$0xff]  ;;  %v86_v31 = vld [vmem:[%s1217_s0 + $0x258] sm:$0xff] }
   0xb   :  { %v23_v32 = vld [vmem:[%s1217_s0 + $0x60] sm:$0xff]  ;;  %v85_v33 = vld [vmem:[%s1217_s0 + $0x250] sm:$0xff]  ;;  %v26_v34 = vld [vmem:[%s1217_s0 + $0x78] sm:$0xff] }
   0xc   :  { %202 = vmatmul.mubr.f32.vlgmr.msra.gmra.mrb[0].mxu0 %v11_v8  ;;  %357 = vmatmul.mubr.f32.vlgmr.msra.gmra.mrb[0].mxu1 %v73_v9  ;;  %v88_v35 = vld [vmem:[%s1217_s0 + $0x268] sm:$0xff]  ;;  %v25_v36 = vld [vmem:[%s1217_s0 + $0x70] sm:$0xff]  ;;  %v87_v37 = vld [vmem:[%s1217_s0 + $0x260] sm:$0xff] }
   0xd   :  { %206 = vmatprep.mubr.f32.mxu0 %v14_v10  ;;  %361 = vmatprep.mubr.f32.mxu1 %v76_v11  ;;  %v28_v38 = vld [vmem:[%s1217_s0 + $0x88] sm:$0xff]  ;;  %v90_v39 = vld [vmem:[%s1217_s0 + $0x278] sm:$0xff]  ;;  %v27_v40 = vld [vmem:[%s1217_s0 + $0x80] sm:$0xff] }
   0xe   :  { %v89_v41 = vld [vmem:[%s1217_s0 + $0x270] sm:$0xff]  ;;  %v30_v42 = vld [vmem:[%s1217_s0 + $0x98] sm:$0xff]  ;;  %v92_v43 = vld [vmem:[%s1217_s0 + $0x288] sm:$0xff] }
   0xf   :  { %v29_v44 = vld [vmem:[%s1217_s0 + $0x90] sm:$0xff]  ;;  %v91_v45 = vld [vmem:[%s1217_s0 + $0x280] sm:$0xff]  ;;  %v32_v46 = vld [vmem:[%s1217_s0 + $0xa8] sm:$0xff] }
  0x10   :  { %207 = vmatmul.mubr.f32.gmra.mrb[2].mxu0 %v13_v12  ;;  %362 = vmatmul.mubr.f32.gmra.mrb[2].mxu1 %v75_v13  ;;  %v94_v47 = vld [vmem:[%s1217_s0 + $0x298] sm:$0xff]  ;;  %v31_v48 = vld [vmem:[%s1217_s0 + $0xa0] sm:$0xff]  ;;  %v93_v49 = vld [vmem:[%s1217_s0 + $0x290] sm:$0xff] }
  0x11   :  { %211 = vmatprep.mubr.f32.mxu0 %v16_v14  ;;  %366 = vmatprep.mubr.f32.mxu1 %v78_v15  ;;  %v34_v50 = vld [vmem:[%s1217_s0 + $0xb8] sm:$0xff]  ;;  %v96_v51 = vld [vmem:[%s1217_s0 + $0x2a8] sm:$0xff]  ;;  %v33_v52 = vld [vmem:[%s1217_s0 + $0xb0] sm:$0xff] }
  0x12   :  { %v95_v53 = vld [vmem:[%s1217_s0 + $0x2a0] sm:$0xff]  ;;  %v36_v54 = vld [vmem:[%s1217_s0 + $0xc8] sm:$0xff]  ;;  %v98_v55 = vld [vmem:[%s1217_s0 + $0x2b8] sm:$0xff] }
  0x13   :  { %v35_v56 = vld [vmem:[%s1217_s0 + $0xc0] sm:$0xff]  ;;  %v97_v57 = vld [vmem:[%s1217_s0 + $0x2b0] sm:$0xff]  ;;  %v38_v58 = vld [vmem:[%s1217_s0 + $0xd8] sm:$0xff] }
  0x14   :  { %212 = vmatmul.mubr.f32.gmra.mrb[4].mxu0 %v15_v16  ;;  %367 = vmatmul.mubr.f32.gmra.mrb[4].mxu1 %v77_v17  ;;  %v100_v59 = vld [vmem:[%s1217_s0 + $0x2c8] sm:$0xff]  ;;  %v37_v60 = vld [vmem:[%s1217_s0 + $0xd0] sm:$0xff]  ;;  %v99_v61 = vld [vmem:[%s1217_s0 + $0x2c0] sm:$0xff] }
  0x15   :  { %216 = vmatprep.mubr.f32.mxu0 %v18_v18  ;;  %371 = vmatprep.mubr.f32.mxu1 %v80_v19  ;;  %v40_v62 = vld [vmem:[%s1217_s0 + $0xe8] sm:$0xff]  ;;  %v102_v63 = vld [vmem:[%s1217_s0 + $0x2d8] sm:$0xff]  ;;  %v39_v0 = vld [vmem:[%s1217_s0 + $0xe0] sm:$0xff] }
  0x16   :  { %v101_v1 = vld [vmem:[%s1217_s0 + $0x2d0] sm:$0xff]  ;;  %v42_v2 = vld [vmem:[%s1217_s0 + $0xf8] sm:$0xff]  ;;  %v104_v3 = vld [vmem:[%s1217_s0 + $0x2e8] sm:$0xff] }
  0x17   :  { %v41_v4 = vld [vmem:[%s1217_s0 + $0xf0] sm:$0xff]  ;;  %v103_v5 = vld [vmem:[%s1217_s0 + $0x2e0] sm:$0xff]  ;;  %v44_v6 = vld [vmem:[%s1217_s0 + $0x108] sm:$0xff] }
  0x18   :  { %217 = vmatmul.mubr.f32.gmra.mrb[6].mxu0 %v17_v20  ;;  %372 = vmatmul.mubr.f32.gmra.mrb[6].mxu1 %v79_v21  ;;  %v106_v7 = vld [vmem:[%s1217_s0 + $0x2f8] sm:$0xff]  ;;  %v43_v8 = vld [vmem:[%s1217_s0 + $0x100] sm:$0xff]  ;;  %v105_v9 = vld [vmem:[%s1217_s0 + $0x2f0] sm:$0xff] }
  0x19   :  { %221 = vmatprep.mubr.f32.mxu0 %v20_v22  ;;  %376 = vmatprep.mubr.f32.mxu1 %v82_v23  ;;  %v46_v10 = vld [vmem:[%s1217_s0 + $0x118] sm:$0xff]  ;;  %v108_v11 = vld [vmem:[%s1217_s0 + $0x308] sm:$0xff]  ;;  %v45_v12 = vld [vmem:[%s1217_s0 + $0x110] sm:$0xff] }
  0x1a   :  { %v107_v13 = vld [vmem:[%s1217_s0 + $0x300] sm:$0xff]  ;;  %v48_v14 = vld [vmem:[%s1217_s0 + $0x128] sm:$0xff]  ;;  %v110_v15 = vld [vmem:[%s1217_s0 + $0x318] sm:$0xff] }
  0x1b   :  { %v47_v16 = vld [vmem:[%s1217_s0 + $0x120] sm:$0xff]  ;;  %v109_v17 = vld [vmem:[%s1217_s0 + $0x310] sm:$0xff]  ;;  %v50_v18 = vld [vmem:[%s1217_s0 + $0x138] sm:$0xff] }
  0x1c   :  { %222 = vmatmul.mubr.f32.gmra.mrb[8].mxu0 %v19_v24  ;;  %377 = vmatmul.mubr.f32.gmra.mrb[8].mxu1 %v81_v25  ;;  %v112_v19 = vld [vmem:[%s1217_s0 + $0x328] sm:$0xff]  ;;  %v49_v20 = vld [vmem:[%s1217_s0 + $0x130] sm:$0xff]  ;;  %v111_v21 = vld [vmem:[%s1217_s0 + $0x320] sm:$0xff] }
  0x1d   :  { %226 = vmatprep.mubr.f32.mxu0 %v22_v26  ;;  %381 = vmatprep.mubr.f32.mxu1 %v84_v27  ;;  %v52_v22 = vld [vmem:[%s1217_s0 + $0x148] sm:$0xff]  ;;  %v114_v23 = vld [vmem:[%s1217_s0 + $0x338] sm:$0xff]  ;;  %v51_v24 = vld [vmem:[%s1217_s0 + $0x140] sm:$0xff] }
  0x1e   :  { %v113_v25 = vld [vmem:[%s1217_s0 + $0x330] sm:$0xff]  ;;  %v54_v26 = vld [vmem:[%s1217_s0 + $0x158] sm:$0xff]  ;;  %v116_v27 = vld [vmem:[%s1217_s0 + $0x348] sm:$0xff] }
  0x20   :  { %227 = vmatmul.mubr.f32.gmra.mrb[10].mxu0 %v21_v28  ;;  %382 = vmatmul.mubr.f32.gmra.mrb[10].mxu1 %v83_v29  ;;  %v53_v28 = vld [vmem:[%s1217_s0 + $0x150] sm:$0xff]  ;;  %v115_v29 = vld [vmem:[%s1217_s0 + $0x340] sm:$0xff] }
  0x21   :  { %231 = vmatprep.mubr.f32.mxu0 %v24_v30  ;;  %386 = vmatprep.mubr.f32.mxu1 %v86_v31  ;;  %v56_v30 = vld [vmem:[%s1217_s0 + $0x168] sm:$0xff]  ;;  %v118_v31 = vld [vmem:[%s1217_s0 + $0x358] sm:$0xff] }
  0x24   :  { %232 = vmatmul.mubr.f32.gmra.mrb[12].mxu0 %v23_v32  ;;  %387 = vmatmul.mubr.f32.gmra.mrb[12].mxu1 %v85_v33  ;;  %v55_v32 = vld [vmem:[%s1217_s0 + $0x160] sm:$0xff]  ;;  %v117_v33 = vld [vmem:[%s1217_s0 + $0x350] sm:$0xff] }
  0x25   :  { %236 = vmatprep.mubr.f32.mxu0 %v26_v34  ;;  %391 = vmatprep.mubr.f32.mxu1 %v88_v35  ;;  %v58_v34 = vld [vmem:[%s1217_s0 + $0x178] sm:$0xff]  ;;  %v120_v35 = vld [vmem:[%s1217_s0 + $0x368] sm:$0xff] }
  0x28   :  { %237 = vmatmul.mubr.f32.gmra.mrb[14].mxu0 %v25_v36  ;;  %392 = vmatmul.mubr.f32.gmra.mrb[14].mxu1 %v87_v37  ;;  %v57_v36 = vld [vmem:[%s1217_s0 + $0x170] sm:$0xff]  ;;  %v119_v37 = vld [vmem:[%s1217_s0 + $0x360] sm:$0xff] }
  0x29   :  { %241 = vmatprep.mubr.f32.mxu0 %v28_v38  ;;  %396 = vmatprep.mubr.f32.mxu1 %v90_v39  ;;  %v60_v38 = vld [vmem:[%s1217_s0 + $0x188] sm:$0xff]  ;;  %v122_v39 = vld [vmem:[%s1217_s0 + $0x378] sm:$0xff] }
  0x2c   :  { %242 = vmatmul.mubr.f32.gmra.mrb[16].mxu0 %v27_v40  ;;  %397 = vmatmul.mubr.f32.gmra.mrb[16].mxu1 %v89_v41  ;;  %v59_v40 = vld [vmem:[%s1217_s0 + $0x180] sm:$0xff]  ;;  %v121_v41 = vld [vmem:[%s1217_s0 + $0x370] sm:$0xff] }
  0x2d   :  { %246 = vmatprep.mubr.f32.mxu0 %v30_v42  ;;  %401 = vmatprep.mubr.f32.mxu1 %v92_v43  ;;  %v62_v42 = vld [vmem:[%s1217_s0 + $0x198] sm:$0xff]  ;;  %v124_v43 = vld [vmem:[%s1217_s0 + $0x388] sm:$0xff] }
  0x30   :  { %247 = vmatmul.mubr.f32.gmra.mrb[18].mxu0 %v29_v44  ;;  %402 = vmatmul.mubr.f32.gmra.mrb[18].mxu1 %v91_v45  ;;  %v61_v44 = vld [vmem:[%s1217_s0 + $0x190] sm:$0xff]  ;;  %v123_v45 = vld [vmem:[%s1217_s0 + $0x380] sm:$0xff] }
  0x31   :  { %251 = vmatprep.mubr.f32.mxu0 %v32_v46  ;;  %406 = vmatprep.mubr.f32.mxu1 %v94_v47  ;;  %v64_v46 = vld [vmem:[%s1217_s0 + $0x1a8] sm:$0xff]  ;;  %v126_v47 = vld [vmem:[%s1217_s0 + $0x398] sm:$0xff] }
  0x34   :  { %252 = vmatmul.mubr.f32.gmra.mrb[20].mxu0 %v31_v48  ;;  %407 = vmatmul.mubr.f32.gmra.mrb[20].mxu1 %v93_v49  ;;  %v63_v48 = vld [vmem:[%s1217_s0 + $0x1a0] sm:$0xff]  ;;  %v125_v49 = vld [vmem:[%s1217_s0 + $0x390] sm:$0xff] }
  0x35   :  { %256 = vmatprep.mubr.f32.mxu0 %v34_v50  ;;  %411 = vmatprep.mubr.f32.mxu1 %v96_v51  ;;  %v66_v50 = vld [vmem:[%s1217_s0 + $0x1b8] sm:$0xff]  ;;  %v128_v51 = vld [vmem:[%s1217_s0 + $0x3a8] sm:$0xff] }
  0x38   :  { %257 = vmatmul.mubr.f32.gmra.mrb[22].mxu0 %v33_v52  ;;  %412 = vmatmul.mubr.f32.gmra.mrb[22].mxu1 %v95_v53  ;;  %v65_v52 = vld [vmem:[%s1217_s0 + $0x1b0] sm:$0xff]  ;;  %v127_v53 = vld [vmem:[%s1217_s0 + $0x3a0] sm:$0xff] }
  0x39   :  { %261 = vmatprep.mubr.f32.mxu0 %v36_v54  ;;  %416 = vmatprep.mubr.f32.mxu1 %v98_v55  ;;  %v68_v54 = vld [vmem:[%s1217_s0 + $0x1c8] sm:$0xff]  ;;  %v130_v55 = vld [vmem:[%s1217_s0 + $0x3b8] sm:$0xff] }
  0x3c   :  { %262 = vmatmul.mubr.f32.gmra.mrb[24].mxu0 %v35_v56  ;;  %417 = vmatmul.mubr.f32.gmra.mrb[24].mxu1 %v97_v57  ;;  %v67_v56 = vld [vmem:[%s1217_s0 + $0x1c0] sm:$0xff]  ;;  %v129_v57 = vld [vmem:[%s1217_s0 + $0x3b0] sm:$0xff] }
  0x3d   :  { %266 = vmatprep.mubr.f32.mxu0 %v38_v58  ;;  %421 = vmatprep.mubr.f32.mxu1 %v100_v59  ;;  %v70_v58 = vld [vmem:[%s1217_s0 + $0x1d8] sm:$0xff]  ;;  %v132_v59 = vld [vmem:[%s1217_s0 + $0x3c8] sm:$0x3f] }
  0x40   :  { %267 = vmatmul.mubr.f32.gmra.mrb[26].mxu0 %v37_v60  ;;  %422 = vmatmul.mubr.f32.gmra.mrb[26].mxu1 %v99_v61  ;;  %v69_v60 = vld [vmem:[%s1217_s0 + $0x1d0] sm:$0xff]  ;;  %v131_v61 = vld [vmem:[%s1217_s0 + $0x3c0] sm:$0x3f] }
  0x41   :  { %271 = vmatprep.mubr.f32.mxu0 %v40_v62  ;;  %426 = vmatprep.mubr.f32.mxu1 %v102_v63  ;;  %v72_v62 = vld [vmem:[%s1217_s0 + $0x1e8] sm:$0xff]  ;;  %v71_v63 = vld [vmem:[%s1217_s0 + $0x1e0] sm:$0xff] }
  0x44   :  { %272 = vmatmul.mubr.f32.gmra.mrb[28].mxu0 %v39_v0  ;;  %427 = vmatmul.mubr.f32.gmra.mrb[28].mxu1 %v101_v1 }
  0x45   :  { %276 = vmatprep.mubr.f32.mxu0 %v42_v2  ;;  %431 = vmatprep.mubr.f32.mxu1 %v104_v3 }
  0x48   :  { %277 = vmatmul.mubr.f32.gmra.mrb[30].mxu0 %v41_v4  ;;  %432 = vmatmul.mubr.f32.gmra.mrb[30].mxu1 %v103_v5 }
  0x49   :  { %281 = vmatprep.mubr.f32.mxu0 %v44_v6  ;;  %436 = vmatprep.mubr.f32.mxu1 %v106_v7 }
  0x4c   :  { %282 = vmatmul.mubr.f32.gmra.mrb[32].mxu0 %v43_v8  ;;  %437 = vmatmul.mubr.f32.gmra.mrb[32].mxu1 %v105_v9 }
  0x4d   :  { %286 = vmatprep.mubr.f32.mxu0 %v46_v10  ;;  %441 = vmatprep.mubr.f32.mxu1 %v108_v11 }
  0x50   :  { %287 = vmatmul.mubr.f32.gmra.mrb[34].mxu0 %v45_v12  ;;  %442 = vmatmul.mubr.f32.gmra.mrb[34].mxu1 %v107_v13 }
  0x51   :  { %291 = vmatprep.mubr.f32.mxu0 %v48_v14  ;;  %446 = vmatprep.mubr.f32.mxu1 %v110_v15 }
  0x54   :  { %292 = vmatmul.mubr.f32.gmra.mrb[36].mxu0 %v47_v16  ;;  %447 = vmatmul.mubr.f32.gmra.mrb[36].mxu1 %v109_v17 }
  0x55   :  { %296 = vmatprep.mubr.f32.mxu0 %v50_v18  ;;  %451 = vmatprep.mubr.f32.mxu1 %v112_v19 }
  0x58   :  { %297 = vmatmul.mubr.f32.gmra.mrb[38].mxu0 %v49_v20  ;;  %452 = vmatmul.mubr.f32.gmra.mrb[38].mxu1 %v111_v21 }
  0x59   :  { %301 = vmatprep.mubr.f32.mxu0 %v52_v22  ;;  %456 = vmatprep.mubr.f32.mxu1 %v114_v23 }
  0x5c   :  { %302 = vmatmul.mubr.f32.gmra.mrb[40].mxu0 %v51_v24  ;;  %457 = vmatmul.mubr.f32.gmra.mrb[40].mxu1 %v113_v25 }
  0x5d   :  { %306 = vmatprep.mubr.f32.mxu0 %v54_v26  ;;  %461 = vmatprep.mubr.f32.mxu1 %v116_v27 }
  0x60   :  { %307 = vmatmul.mubr.f32.gmra.mrb[42].mxu0 %v53_v28  ;;  %462 = vmatmul.mubr.f32.gmra.mrb[42].mxu1 %v115_v29 }
  0x61   :  { %311 = vmatprep.mubr.f32.mxu0 %v56_v30  ;;  %466 = vmatprep.mubr.f32.mxu1 %v118_v31 }
  0x64   :  { %312 = vmatmul.mubr.f32.gmra.mrb[44].mxu0 %v55_v32  ;;  %467 = vmatmul.mubr.f32.gmra.mrb[44].mxu1 %v117_v33 }
  0x65   :  { %316 = vmatprep.mubr.f32.mxu0 %v58_v34  ;;  %471 = vmatprep.mubr.f32.mxu1 %v120_v35 }
  0x68   :  { %317 = vmatmul.mubr.f32.gmra.mrb[46].mxu0 %v57_v36  ;;  %472 = vmatmul.mubr.f32.gmra.mrb[46].mxu1 %v119_v37 }
  0x69   :  { %321 = vmatprep.mubr.f32.mxu0 %v60_v38  ;;  %476 = vmatprep.mubr.f32.mxu1 %v122_v39 }
  0x6c   :  { %322 = vmatmul.mubr.f32.gmra.mrb[48].mxu0 %v59_v40  ;;  %477 = vmatmul.mubr.f32.gmra.mrb[48].mxu1 %v121_v41 }
  0x6d   :  { %326 = vmatprep.mubr.f32.mxu0 %v62_v42  ;;  %481 = vmatprep.mubr.f32.mxu1 %v124_v43 }
  0x70   :  { %327 = vmatmul.mubr.f32.gmra.mrb[50].mxu0 %v61_v44  ;;  %482 = vmatmul.mubr.f32.gmra.mrb[50].mxu1 %v123_v45 }
  0x71   :  { %331 = vmatprep.mubr.f32.mxu0 %v64_v46  ;;  %486 = vmatprep.mubr.f32.mxu1 %v126_v47 }
  0x74   :  { %332 = vmatmul.mubr.f32.gmra.mrb[52].mxu0 %v63_v48  ;;  %487 = vmatmul.mubr.f32.gmra.mrb[52].mxu1 %v125_v49 }
  0x75   :  { %336 = vmatprep.mubr.f32.mxu0 %v66_v50  ;;  %491 = vmatprep.mubr.f32.mxu1 %v128_v51 }
  0x78   :  { %337 = vmatmul.mubr.f32.gmra.mrb[54].mxu0 %v65_v52  ;;  %492 = vmatmul.mubr.f32.gmra.mrb[54].mxu1 %v127_v53 }
  0x79   :  { %341 = vmatprep.mubr.f32.mxu0 %v68_v54  ;;  %496 = vmatprep.mubr.f32.mxu1 %v130_v55 }
  0x7c   :  { %342 = vmatmul.mubr.f32.gmra.mrb[56].mxu0 %v67_v56  ;;  %497 = vmatmul.mubr.f32.gmra.mrb[56].mxu1 %v129_v57 }
  0x7d   :  { %346 = vmatprep.mubr.f32.mxu0 %v70_v58  ;;  %501 = vmatprep.mubr.f32.mxu1 %v132_v59 }
  0x80   :  { %347 = vmatmul.mubr.f32.gmra.mrb[58].mxu0 %v69_v60  ;;  %502 = vmatmul.mubr.f32.gmra.mrb[58].mxu1 %v131_v61 }
  0x81   :  { %351 = vmatprep.mubr.f32.mxu0 %v72_v62 }
  0x84   :  { %352 = vmatmul.mubr.f32.gmra.mrb[60].mxu0 %v71_v63 }
  0xdf   :  { %v203_v0 = vpop.f32.mrb[0].mxu0  ;;  %v358_v1 = vpop.f32.mrb[0].mxu1 }
  0xe0   :  { %508 = vst.msk [vmem:[%s1218_s2] sm:$0xff] %vm507_vm0, %v203_v0  ;;  %v205_v2 = vpop.f32.mrb[1].mxu0  ;;  %539 = vst.msk [vmem:[%s1218_s2 + $0xf8] sm:$0xff] %vm507_vm0, %v358_v1  ;;  %v360_v3 = vpop.f32.mrb[1].mxu1 }
  0xe3   :  { %v208_v4 = vpop.f32.mrb[2].mxu0  ;;  %v363_v5 = vpop.f32.mrb[2].mxu1 }
  0xe4   :  { %509 = vst.msk [vmem:[%s1218_s2 + $0x8] sm:$0xff] %vm507_vm0, %v208_v4  ;;  %v210_v6 = vpop.f32.mrb[3].mxu0  ;;  %540 = vst.msk [vmem:[%s1218_s2 + $0x100] sm:$0xff] %vm507_vm0, %v363_v5  ;;  %v365_v7 = vpop.f32.mrb[3].mxu1 }
  0xe7   :  { %v213_v8 = vpop.f32.mrb[4].mxu0  ;;  %v368_v9 = vpop.f32.mrb[4].mxu1 }
  0xe8   :  { %510 = vst.msk [vmem:[%s1218_s2 + $0x10] sm:$0xff] %vm507_vm0, %v213_v8  ;;  %v215_v10 = vpop.f32.mrb[5].mxu0  ;;  %541 = vst.msk [vmem:[%s1218_s2 + $0x108] sm:$0xff] %vm507_vm0, %v368_v9  ;;  %v370_v11 = vpop.f32.mrb[5].mxu1 }
  0xeb   :  { %v218_v12 = vpop.f32.mrb[6].mxu0  ;;  %v373_v13 = vpop.f32.mrb[6].mxu1 }
  0xec   :  { %511 = vst.msk [vmem:[%s1218_s2 + $0x18] sm:$0xff] %vm507_vm0, %v218_v12  ;;  %v220_v14 = vpop.f32.mrb[7].mxu0  ;;  %542 = vst.msk [vmem:[%s1218_s2 + $0x110] sm:$0xff] %vm507_vm0, %v373_v13  ;;  %v375_v15 = vpop.f32.mrb[7].mxu1 }
  0xef   :  { %v223_v16 = vpop.f32.mrb[8].mxu0  ;;  %v378_v17 = vpop.f32.mrb[8].mxu1 }
  0xf0   :  { %512 = vst.msk [vmem:[%s1218_s2 + $0x20] sm:$0xff] %vm507_vm0, %v223_v16  ;;  %v225_v18 = vpop.f32.mrb[9].mxu0  ;;  %543 = vst.msk [vmem:[%s1218_s2 + $0x118] sm:$0xff] %vm507_vm0, %v378_v17  ;;  %v380_v19 = vpop.f32.mrb[9].mxu1 }
  0xf3   :  { %v228_v20 = vpop.f32.mrb[10].mxu0  ;;  %v383_v21 = vpop.f32.mrb[10].mxu1 }
  0xf4   :  { %513 = vst.msk [vmem:[%s1218_s2 + $0x28] sm:$0xff] %vm507_vm0, %v228_v20  ;;  %v230_v22 = vpop.f32.mrb[11].mxu0  ;;  %544 = vst.msk [vmem:[%s1218_s2 + $0x120] sm:$0xff] %vm507_vm0, %v383_v21  ;;  %v385_v23 = vpop.f32.mrb[11].mxu1 }
  0xf7   :  { %v233_v24 = vpop.f32.mrb[12].mxu0  ;;  %v388_v25 = vpop.f32.mrb[12].mxu1 }
  0xf8   :  { %514 = vst.msk [vmem:[%s1218_s2 + $0x30] sm:$0xff] %vm507_vm0, %v233_v24  ;;  %v235_v26 = vpop.f32.mrb[13].mxu0  ;;  %545 = vst.msk [vmem:[%s1218_s2 + $0x128] sm:$0xff] %vm507_vm0, %v388_v25  ;;  %v390_v27 = vpop.f32.mrb[13].mxu1 }
  0xfb   :  { %v238_v28 = vpop.f32.mrb[14].mxu0  ;;  %v393_v29 = vpop.f32.mrb[14].mxu1 }
  0xfc   :  { %515 = vst.msk [vmem:[%s1218_s2 + $0x38] sm:$0xff] %vm507_vm0, %v238_v28  ;;  %v240_v30 = vpop.f32.mrb[15].mxu0  ;;  %546 = vst.msk [vmem:[%s1218_s2 + $0x130] sm:$0xff] %vm507_vm0, %v393_v29  ;;  %v395_v31 = vpop.f32.mrb[15].mxu1 }
  0xff   :  { %v243_v32 = vpop.f32.mrb[16].mxu0  ;;  %v398_v33 = vpop.f32.mrb[16].mxu1 }
 0x100   :  { %516 = vst.msk [vmem:[%s1218_s2 + $0x40] sm:$0xff] %vm507_vm0, %v243_v32  ;;  %v245_v34 = vpop.f32.mrb[17].mxu0  ;;  %547 = vst.msk [vmem:[%s1218_s2 + $0x138] sm:$0xff] %vm507_vm0, %v398_v33  ;;  %v400_v35 = vpop.f32.mrb[17].mxu1 }
 0x103   :  { %v248_v36 = vpop.f32.mrb[18].mxu0  ;;  %v403_v37 = vpop.f32.mrb[18].mxu1 }
 0x104   :  { %517 = vst.msk [vmem:[%s1218_s2 + $0x48] sm:$0xff] %vm507_vm0, %v248_v36  ;;  %v250_v38 = vpop.f32.mrb[19].mxu0  ;;  %548 = vst.msk [vmem:[%s1218_s2 + $0x140] sm:$0xff] %vm507_vm0, %v403_v37  ;;  %v405_v39 = vpop.f32.mrb[19].mxu1 }
 0x107   :  { %v253_v40 = vpop.f32.mrb[20].mxu0  ;;  %v408_v41 = vpop.f32.mrb[20].mxu1 }
 0x108   :  { %518 = vst.msk [vmem:[%s1218_s2 + $0x50] sm:$0xff] %vm507_vm0, %v253_v40  ;;  %v255_v42 = vpop.f32.mrb[21].mxu0  ;;  %549 = vst.msk [vmem:[%s1218_s2 + $0x148] sm:$0xff] %vm507_vm0, %v408_v41  ;;  %v410_v43 = vpop.f32.mrb[21].mxu1 }
 0x10b   :  { %v258_v44 = vpop.f32.mrb[22].mxu0  ;;  %v413_v45 = vpop.f32.mrb[22].mxu1 }
 0x10c   :  { %519 = vst.msk [vmem:[%s1218_s2 + $0x58] sm:$0xff] %vm507_vm0, %v258_v44  ;;  %v260_v46 = vpop.f32.mrb[23].mxu0  ;;  %550 = vst.msk [vmem:[%s1218_s2 + $0x150] sm:$0xff] %vm507_vm0, %v413_v45  ;;  %v415_v47 = vpop.f32.mrb[23].mxu1 }
 0x10f   :  { %v263_v48 = vpop.f32.mrb[24].mxu0  ;;  %v418_v49 = vpop.f32.mrb[24].mxu1 }
 0x110   :  { %520 = vst.msk [vmem:[%s1218_s2 + $0x60] sm:$0xff] %vm507_vm0, %v263_v48  ;;  %v265_v50 = vpop.f32.mrb[25].mxu0  ;;  %551 = vst.msk [vmem:[%s1218_s2 + $0x158] sm:$0xff] %vm507_vm0, %v418_v49  ;;  %v420_v51 = vpop.f32.mrb[25].mxu1 }
 0x113   :  { %v268_v52 = vpop.f32.mrb[26].mxu0  ;;  %v423_v53 = vpop.f32.mrb[26].mxu1 }
 0x114   :  { %521 = vst.msk [vmem:[%s1218_s2 + $0x68] sm:$0xff] %vm507_vm0, %v268_v52  ;;  %v270_v54 = vpop.f32.mrb[27].mxu0  ;;  %552 = vst.msk [vmem:[%s1218_s2 + $0x160] sm:$0xff] %vm507_vm0, %v423_v53  ;;  %v425_v55 = vpop.f32.mrb[27].mxu1 }
 0x117   :  { %v273_v56 = vpop.f32.mrb[28].mxu0  ;;  %v428_v57 = vpop.f32.mrb[28].mxu1 }
 0x118   :  { %522 = vst.msk [vmem:[%s1218_s2 + $0x70] sm:$0xff] %vm507_vm0, %v273_v56  ;;  %v275_v58 = vpop.f32.mrb[29].mxu0  ;;  %553 = vst.msk [vmem:[%s1218_s2 + $0x168] sm:$0xff] %vm507_vm0, %v428_v57  ;;  %v430_v59 = vpop.f32.mrb[29].mxu1 }
 0x11b   :  { %v278_v60 = vpop.f32.mrb[30].mxu0  ;;  %v433_v61 = vpop.f32.mrb[30].mxu1 }
 0x11c   :  { %523 = vst.msk [vmem:[%s1218_s2 + $0x78] sm:$0xff] %vm507_vm0, %v278_v60  ;;  %v280_v62 = vpop.f32.mrb[31].mxu0  ;;  %554 = vst.msk [vmem:[%s1218_s2 + $0x170] sm:$0xff] %vm507_vm0, %v433_v61  ;;  %v435_v63 = vpop.f32.mrb[31].mxu1 }
 0x11f   :  { %v283_v0 = vpop.f32.mrb[32].mxu0  ;;  %v438_v1 = vpop.f32.mrb[32].mxu1 }
 0x120   :  { %524 = vst.msk [vmem:[%s1218_s2 + $0x80] sm:$0xff] %vm507_vm0, %v283_v0  ;;  %v285_v2 = vpop.f32.mrb[33].mxu0  ;;  %555 = vst.msk [vmem:[%s1218_s2 + $0x178] sm:$0xff] %vm507_vm0, %v438_v1  ;;  %v440_v3 = vpop.f32.mrb[33].mxu1 }
 0x123   :  { %v288_v4 = vpop.f32.mrb[34].mxu0  ;;  %v443_v5 = vpop.f32.mrb[34].mxu1 }
 0x124   :  { %525 = vst.msk [vmem:[%s1218_s2 + $0x88] sm:$0xff] %vm507_vm0, %v288_v4  ;;  %v290_v6 = vpop.f32.mrb[35].mxu0  ;;  %556 = vst.msk [vmem:[%s1218_s2 + $0x180] sm:$0xff] %vm507_vm0, %v443_v5  ;;  %v445_v7 = vpop.f32.mrb[35].mxu1 }
 0x127   :  { %v293_v8 = vpop.f32.mrb[36].mxu0  ;;  %v448_v9 = vpop.f32.mrb[36].mxu1 }
 0x128   :  { %526 = vst.msk [vmem:[%s1218_s2 + $0x90] sm:$0xff] %vm507_vm0, %v293_v8  ;;  %v295_v10 = vpop.f32.mrb[37].mxu0  ;;  %557 = vst.msk [vmem:[%s1218_s2 + $0x188] sm:$0xff] %vm507_vm0, %v448_v9  ;;  %v450_v11 = vpop.f32.mrb[37].mxu1 }
 0x12b   :  { %v298_v12 = vpop.f32.mrb[38].mxu0  ;;  %v453_v13 = vpop.f32.mrb[38].mxu1 }
 0x12c   :  { %527 = vst.msk [vmem:[%s1218_s2 + $0x98] sm:$0xff] %vm507_vm0, %v298_v12  ;;  %v300_v14 = vpop.f32.mrb[39].mxu0  ;;  %558 = vst.msk [vmem:[%s1218_s2 + $0x190] sm:$0xff] %vm507_vm0, %v453_v13  ;;  %v455_v15 = vpop.f32.mrb[39].mxu1 }
 0x12f   :  { %v303_v16 = vpop.f32.mrb[40].mxu0  ;;  %v458_v17 = vpop.f32.mrb[40].mxu1 }
 0x130   :  { %528 = vst.msk [vmem:[%s1218_s2 + $0xa0] sm:$0xff] %vm507_vm0, %v303_v16  ;;  %v305_v18 = vpop.f32.mrb[41].mxu0  ;;  %559 = vst.msk [vmem:[%s1218_s2 + $0x198] sm:$0xff] %vm507_vm0, %v458_v17  ;;  %v460_v19 = vpop.f32.mrb[41].mxu1 }
 0x133   :  { %v308_v20 = vpop.f32.mrb[42].mxu0  ;;  %v463_v21 = vpop.f32.mrb[42].mxu1 }
 0x134   :  { %529 = vst.msk [vmem:[%s1218_s2 + $0xa8] sm:$0xff] %vm507_vm0, %v308_v20  ;;  %v310_v22 = vpop.f32.mrb[43].mxu0  ;;  %560 = vst.msk [vmem:[%s1218_s2 + $0x1a0] sm:$0xff] %vm507_vm0, %v463_v21  ;;  %v465_v23 = vpop.f32.mrb[43].mxu1 }
 0x137   :  { %v313_v24 = vpop.f32.mrb[44].mxu0  ;;  %v468_v25 = vpop.f32.mrb[44].mxu1 }
 0x138   :  { %530 = vst.msk [vmem:[%s1218_s2 + $0xb0] sm:$0xff] %vm507_vm0, %v313_v24  ;;  %v315_v26 = vpop.f32.mrb[45].mxu0  ;;  %561 = vst.msk [vmem:[%s1218_s2 + $0x1a8] sm:$0xff] %vm507_vm0, %v468_v25  ;;  %v470_v27 = vpop.f32.mrb[45].mxu1 }
 0x13b   :  { %v318_v28 = vpop.f32.mrb[46].mxu0  ;;  %v473_v29 = vpop.f32.mrb[46].mxu1 }
 0x13c   :  { %531 = vst.msk [vmem:[%s1218_s2 + $0xb8] sm:$0xff] %vm507_vm0, %v318_v28  ;;  %v320_v30 = vpop.f32.mrb[47].mxu0  ;;  %562 = vst.msk [vmem:[%s1218_s2 + $0x1b0] sm:$0xff] %vm507_vm0, %v473_v29  ;;  %v475_v31 = vpop.f32.mrb[47].mxu1 }
 0x13f   :  { %v323_v32 = vpop.f32.mrb[48].mxu0  ;;  %v478_v33 = vpop.f32.mrb[48].mxu1 }
 0x140   :  { %532 = vst.msk [vmem:[%s1218_s2 + $0xc0] sm:$0xff] %vm507_vm0, %v323_v32  ;;  %v325_v34 = vpop.f32.mrb[49].mxu0  ;;  %563 = vst.msk [vmem:[%s1218_s2 + $0x1b8] sm:$0xff] %vm507_vm0, %v478_v33  ;;  %v480_v35 = vpop.f32.mrb[49].mxu1 }
 0x143   :  { %v328_v36 = vpop.f32.mrb[50].mxu0  ;;  %v483_v37 = vpop.f32.mrb[50].mxu1 }
 0x144   :  { %533 = vst.msk [vmem:[%s1218_s2 + $0xc8] sm:$0xff] %vm507_vm0, %v328_v36  ;;  %v330_v38 = vpop.f32.mrb[51].mxu0  ;;  %564 = vst.msk [vmem:[%s1218_s2 + $0x1c0] sm:$0xff] %vm507_vm0, %v483_v37  ;;  %v485_v39 = vpop.f32.mrb[51].mxu1 }
 0x147   :  { %v333_v40 = vpop.f32.mrb[52].mxu0  ;;  %v488_v41 = vpop.f32.mrb[52].mxu1 }
 0x148   :  { %534 = vst.msk [vmem:[%s1218_s2 + $0xd0] sm:$0xff] %vm507_vm0, %v333_v40  ;;  %v335_v42 = vpop.f32.mrb[53].mxu0  ;;  %565 = vst.msk [vmem:[%s1218_s2 + $0x1c8] sm:$0xff] %vm507_vm0, %v488_v41  ;;  %v490_v43 = vpop.f32.mrb[53].mxu1 }
 0x14b   :  { %v338_v44 = vpop.f32.mrb[54].mxu0  ;;  %v493_v45 = vpop.f32.mrb[54].mxu1 }
 0x14c   :  { %535 = vst.msk [vmem:[%s1218_s2 + $0xd8] sm:$0xff] %vm507_vm0, %v338_v44  ;;  %v340_v46 = vpop.f32.mrb[55].mxu0  ;;  %566 = vst.msk [vmem:[%s1218_s2 + $0x1d0] sm:$0xff] %vm507_vm0, %v493_v45  ;;  %v495_v47 = vpop.f32.mrb[55].mxu1 }
 0x14f   :  { %v343_v48 = vpop.f32.mrb[56].mxu0  ;;  %v498_v49 = vpop.f32.mrb[56].mxu1 }
 0x150   :  { %536 = vst.msk [vmem:[%s1218_s2 + $0xe0] sm:$0xff] %vm507_vm0, %v343_v48  ;;  %v345_v50 = vpop.f32.mrb[57].mxu0  ;;  %567 = vst.msk [vmem:[%s1218_s2 + $0x1d8] sm:$0xff] %vm507_vm0, %v498_v49  ;;  %v500_v51 = vpop.f32.mrb[57].mxu1 }
 0x153   :  { %v348_v52 = vpop.f32.mrb[58].mxu0  ;;  %v503_v53 = vpop.f32.mrb[58].mxu1 }
 0x154   :  { %537 = vst.msk [vmem:[%s1218_s2 + $0xe8] sm:$0xff] %vm507_vm0, %v348_v52  ;;  %v350_v54 = vpop.f32.mrb[59].mxu0  ;;  %v505_v55 = vpop.f32.mrb[59].mxu1 }
 0x155   :  { %569 = vst.msk [vmem:[%s1218_s2 + $0x1e0] sm:$0x3f] %vm568_vm1, %v503_v53 }
 0x157   :  { %v353_v56 = vpop.f32.mrb[60].mxu0 }
 0x158   :  { %538 = vst.msk [vmem:[%s1218_s2 + $0xf0] sm:$0xff] %vm507_vm0, %v353_v56  ;;  %v355_v57 = vpop.f32.mrb[61].mxu0 }

// kernel: a_call__.9
= control target key start
LH: loop header
LB: loop body
LE: loop exit
PB: predicated region body
PF: predicated region fallthrough
CT: control target
= control target key end

     0   :  { %v104_v3 = vlaneseq  ;;  %v1555_v8 = vmov 1983009808   ;;  %s1826_s0 = inlined_call_operand.vmem [shape: f32[2,3888], index: 0, kind: input, shape index: {}]   ;;  %s1827_s1 = inlined_call_operand.vmem [shape: f32[10,3888], index: 1, kind: input, shape index: {}]   ;;  %s1828_s2 = inlined_call_operand.vmem [shape: f32[1,10], index: 2, kind: input, shape index: {}]   ;;  %s1829_s3 = inlined_call_operand.hbm [shape: f32[2,10], index: 3, kind: output, shape index: {}]  }
   0x1   :  { %v24_v0 = vld [vmem:[%s1827_s1 + $0x8] sm:$0xff]  ;;  %v55_v1 = vld [vmem:[%s1827_s1 + $0x100] sm:$0x3]  ;;  %v54_v5 = vld [vmem:[%s1827_s1 + $0xf8] sm:$0x3]  ;;  %v102_v9 = vunpack.c.l.s4 %v1555_v8 }
   0x2   :  { %v23_v2 = vld [vmem:[%s1827_s1] sm:$0xff]  ;;  %v1424_v4 = vpack.c.bf16 %v55_v1, %v24_v0  ;;  %v40_v6 = vld [vmem:[%s1827_s1 + $0x88] sm:$0xff]  ;;  %v70_v13 = vld [vmem:[%s1827_s1 + $0x178] sm:$0x3]  ;;  %v105_v15 = vshrl.u32 %v104_v3, 7 }
   0x3   :  { %v71_v7 = vld [vmem:[%s1827_s1 + $0x180] sm:$0x3]  ;;  %v1426_v10 = vpack.c.bf16 %v54_v5, %v23_v2  ;;  %v103_v18 = vunpack.c.0.s8 %v102_v9  ;;  %v26_v19 = vld [vmem:[%s1827_s1 + $0x18] sm:$0xff]  ;;  %v57_v20 = vld [vmem:[%s1827_s1 + $0x110] sm:$0x3] }
   0x4   :  { %v1456_v11 = vpack.c.bf16 %v71_v7, %v40_v6  ;;  %v39_v12 = vld [vmem:[%s1827_s1 + $0x80] sm:$0xff]  ;;  %1425 = vmatprep.subr.bf16.mxu1 %v1424_v4  ;;  %v1428_v22 = vpack.c.bf16 %v57_v20, %v26_v19  ;;  %v42_v24 = vld [vmem:[%s1827_s1 + $0x98] sm:$0xff]  ;;  %v25_v26 = vld [vmem:[%s1827_s1 + $0x10] sm:$0xff] }
   0x5   :  { %v15_v14 = vld [vmem:[%s1826_s0] sm:$0xff]  ;;  %v1458_v16 = vpack.c.bf16 %v70_v13, %v39_v12  ;;  %1427 = vmatpush1.bf16.xpose.msra.mxu1 %v1426_v10  ;;  %v1619_v25 = vsub.s32 %v103_v18, %v105_v15  ;;  %v73_v27 = vld [vmem:[%s1827_s1 + $0x190] sm:$0x3]  ;;  %v56_v28 = vld [vmem:[%s1827_s1 + $0x108] sm:$0x3] }
   0x6   :  { %v100_v17 = vcombine.high %v15_v14, %v15_v14  ;;  %v19_v21 = vld [vmem:[%s1826_s0 + $0x20] sm:$0xff]  ;;  %1457 = vmatprep.subr.bf16.mxu0 %v1456_v11  ;;  %1429 = vmatprep.subr.bf16.mxu1 %v1428_v22  ;;  %v1460_v29 = vpack.c.bf16 %v73_v27, %v42_v24  ;;  %v41_v30 = vld [vmem:[%s1827_s1 + $0x90] sm:$0xff]  ;;  %v72_v31 = vld [vmem:[%s1827_s1 + $0x188] sm:$0x3]  ;;  %v1430_v42 = vpack.c.bf16 %v56_v28, %v25_v26 }
   0x7   :  { %v168_v23 = vcombine.high %v19_v21, %v19_v21  ;;  %1459 = vmatpush1.bf16.xpose.msra.mxu0 %v1458_v16  ;;  %v107_v32 = vrot.slane %v15_v14, %v1619_v25  ;;  %v175_v33 = vrot.slane %v19_v21, %v1619_v25  ;;  %v28_v35 = vld [vmem:[%s1827_s1 + $0x28] sm:$0xff]  ;;  %v59_v36 = vld [vmem:[%s1827_s1 + $0x120] sm:$0x3]  ;;  %v1462_v43 = vpack.c.bf16 %v72_v31, %v41_v30  ;;  %v58_v51 = vld [vmem:[%s1827_s1 + $0x118] sm:$0x3] }
   0x8   :  { %v114_v34 = vrot.slane %v100_v17, %v1619_v25  ;;  %1461 = vmatprep.subr.bf16.mxu0 %v1460_v29  ;;  %v44_v38 = vld [vmem:[%s1827_s1 + $0xa8] sm:$0xff]  ;;  %v75_v39 = vld [vmem:[%s1827_s1 + $0x1a0] sm:$0x3]  ;;  %v1432_v45 = vpack.c.bf16 %v59_v36, %v28_v35  ;;  %v74_v53 = vld [vmem:[%s1827_s1 + $0x198] sm:$0x3] }
   0x9   :  { %v182_v37 = vrot.slane %v168_v23, %v1619_v25  ;;  %v115_v40 = vcombine.high %v107_v32, %v107_v32  ;;  %v183_v41 = vcombine.high %v175_v33, %v175_v33  ;;  %v1464_v47 = vpack.c.bf16 %v75_v39, %v44_v38  ;;  %v16_v48 = vld [vmem:[%s1826_s0 + $0x8] sm:$0xff]  ;;  %v27_v50 = vld [vmem:[%s1827_s1 + $0x20] sm:$0xff]  ;;  %v30_v55 = vld [vmem:[%s1827_s1 + $0x38] sm:$0xff] }
   0xa   :  { %v116_v44 = vcombine.high %v114_v34, %v114_v34  ;;  %v20_v49 = vld [vmem:[%s1826_s0 + $0x28] sm:$0xff]  ;;  %v43_v52 = vld [vmem:[%s1827_s1 + $0xa0] sm:$0xff]  ;;  %v124_v54 = vrot.slane %v16_v48, %v1619_v25  ;;  %v61_v56 = vld [vmem:[%s1827_s1 + $0x130] sm:$0x3]  ;;  %v1434_v60 = vpack.c.bf16 %v58_v51, %v27_v50  ;;  %v117_v0 = vcombine.high %v16_v48, %v16_v48 }
   0xb   :  { %338 = vmatprep.mubr.f32.mxu1 %v115_v40  ;;  %898 = vmatprep.mubr.f32.mxu0 %v183_v41  ;;  %v184_v46 = vcombine.high %v182_v37, %v182_v37  ;;  %v192_v57 = vrot.slane %v20_v49, %v1619_v25  ;;  %v46_v58 = vld [vmem:[%s1827_s1 + $0xb8] sm:$0xff]  ;;  %v77_v59 = vld [vmem:[%s1827_s1 + $0x1b0] sm:$0x3]  ;;  %v1466_v61 = vpack.c.bf16 %v74_v53, %v43_v52  ;;  %v60_v5 = vld [vmem:[%s1827_s1 + $0x128] sm:$0x3] }
   0xc   :  { %339 = vmatmul.mubr.f32.vlgmr.msra.gmra.mrb[0].mxu1 %v107_v32  ;;  %v132_v62 = vcombine.high %v124_v54, %v124_v54  ;;  %v1436_v63 = vpack.c.bf16 %v61_v56, %v30_v55  ;;  %v1468_v2 = vpack.c.bf16 %v77_v59, %v46_v58  ;;  %v185_v3 = vcombine.high %v20_v49, %v20_v49  ;;  %v29_v4 = vld [vmem:[%s1827_s1 + $0x30] sm:$0xff]  ;;  %v76_v7 = vld [vmem:[%s1827_s1 + $0x1a8] sm:$0x3]  ;;  %v63_v10 = vld [vmem:[%s1827_s1 + $0x140] sm:$0x3] }
   0xd   :  { %1431 = vmatpush1.bf16.xpose.msra.mxu1 %v1430_v42  ;;  %408 = vmatprep.mubr.f32.mxu1 %v116_v44  ;;  %v200_v1 = vcombine.high %v192_v57, %v192_v57  ;;  %v45_v6 = vld [vmem:[%s1827_s1 + $0xb0] sm:$0xff]  ;;  %v131_v8 = vrot.slane %v117_v0, %v1619_v25  ;;  %v32_v9 = vld [vmem:[%s1827_s1 + $0x48] sm:$0xff]  ;;  %v79_v13 = vld [vmem:[%s1827_s1 + $0x1c0] sm:$0x3] }
   0xe   :  { %899 = vmatmul.mubr.f32.vlgmr.msra.gmra.mrb[0].mxu0 %v175_v33  ;;  %1433 = vmatprep.subr.bf16.mxu1 %v1432_v45  ;;  %v199_v11 = vrot.slane %v185_v3, %v1619_v25  ;;  %v48_v12 = vld [vmem:[%s1827_s1 + $0xc8] sm:$0xff] }
   0xf   :  { %1463 = vmatpush1.bf16.xpose.msra.mxu0 %v1462_v43  ;;  %968 = vmatprep.mubr.f32.mxu0 %v184_v46 }
  0x10   :  { %1465 = vmatprep.subr.bf16.mxu0 %v1464_v47 }
  0x14   :  { %409 = vmatmul.mubr.f32.vlgmr.msra.gmra.mrb[0].mxu1 %v114_v34 }
  0x15   :  { %1435 = vmatpush1.bf16.xpose.msra.mxu1 %v1434_v60  ;;  %478 = vmatprep.mubr.f32.mxu1 %v132_v62 }
  0x16   :  { %969 = vmatmul.mubr.f32.vlgmr.msra.gmra.mrb[0].mxu0 %v182_v37  ;;  %1437 = vmatprep.subr.bf16.mxu1 %v1436_v63 }
  0x17   :  { %1467 = vmatpush1.bf16.xpose.msra.mxu0 %v1466_v61  ;;  %1038 = vmatprep.mubr.f32.mxu0 %v200_v1 }
  0x18   :  { %1469 = vmatprep.subr.bf16.mxu0 %v1468_v2 }
  0x19   :  { %8 = vsyncpa [#allocation3], 0  ;;  %v1438_v14 = vpack.c.bf16 %v60_v5, %v29_v4  ;;  %v1470_v15 = vpack.c.bf16 %v76_v7, %v45_v6  ;;  %v133_v16 = vcombine.high %v131_v8, %v131_v8  ;;  %v1440_v17 = vpack.c.bf16 %v63_v10, %v32_v9  ;;  %v17_v20 = vld [vmem:[%s1826_s0 + $0x10] sm:$0xff]  ;;  %v31_v22 = vld [vmem:[%s1827_s1 + $0x40] sm:$0xff]  ;;  %s1559_s17 = smov [#allocation2]  }
  0x1a   :  { %v201_v18 = vcombine.high %v199_v11, %v199_v11  ;;  %v1472_v19 = vpack.c.bf16 %v79_v13, %v48_v12  ;;  %v21_v21 = vld [vmem:[%s1826_s0 + $0x30] sm:$0xff]  ;;  %v62_v23 = vld [vmem:[%s1827_s1 + $0x138] sm:$0x3]  ;;  %v47_v24 = vld [vmem:[%s1827_s1 + $0xc0] sm:$0xff]  ;;  %v141_v27 = vrot.slane %v17_v20, %v1619_v25  ;;  %v134_v37 = vcombine.high %v17_v20, %v17_v20  ;;  %s1402_s18 = sshll.u32 %s1559_s17, 4  ;;  %s1403_s18 = int_to_ptr.vmem [resolvable:$true] %s1402_s18 }
  0x1b   :  { %v78_v26 = vld [vmem:[%s1827_s1 + $0x1b8] sm:$0x3]  ;;  %v65_v29 = vld [vmem:[%s1827_s1 + $0x150] sm:$0x3]  ;;  %v209_v30 = vrot.slane %v21_v21, %v1619_v25  ;;  %v1442_v33 = vpack.c.bf16 %v62_v23, %v31_v22  ;;  %v202_v40 = vcombine.high %v21_v21, %v21_v21  ;;  %v64_v42 = vld [vmem:[%s1827_s1 + $0x148] sm:$0x3]  ;;  %p1536_p1 = scmp.lt.s32.totalorder %s1403_s18, %s1403_s18 }
  0x1c   :  { %479 = vmatmul.mubr.f32.vlgmr.msra.gmra.mrb[0].mxu1 %v124_v54  ;;  %v34_v28 = vld [vmem:[%s1827_s1 + $0x58] sm:$0xff]  ;;  %v81_v32 = vld [vmem:[%s1827_s1 + $0x1d0] sm:$0x3]  ;;  %v1474_v34 = vpack.c.bf16 %v78_v26, %v47_v24  ;;  %v149_v35 = vcombine.high %v141_v27, %v141_v27  ;;  %v80_v44 = vld [vmem:[%s1827_s1 + $0x1c8] sm:$0x3]  ;;  %v148_v45 = vrot.slane %v134_v37, %v1619_v25  ;;  %vm265_vm0 = vcmask 392192  }
  0x1d   :  { %1439 = vmatpush1.bf16.xpose.msra.mxu1 %v1438_v14  ;;  %548 = vmatprep.mubr.f32.mxu1 %v133_v16  ;;  %v50_v31 = vld [vmem:[%s1827_s1 + $0xd8] sm:$0xff]  ;;  %v1444_v36 = vpack.c.bf16 %v65_v29, %v34_v28  ;;  %v217_v38 = vcombine.high %v209_v30, %v209_v30  ;;  %v33_v41 = vld [vmem:[%s1827_s1 + $0x50] sm:$0xff]  ;;  %v36_v46 = vld [vmem:[%s1827_s1 + $0x68] sm:$0xff]  ;;  %v216_v48 = vrot.slane %v202_v40, %v1619_v25  ;;  %v1556_v14 = vmov 0.0|0.0   ;;  %s1531_s19 = scalar_lea.vmem %s1403_s18, 32 }
  0x1e   :  { %1039 = vmatmul.mubr.f32.vlgmr.msra.gmra.mrb[0].mxu0 %v192_v57  ;;  %1441 = vmatprep.subr.bf16.mxu1 %v1440_v17  ;;  %v1476_v39 = vpack.c.bf16 %v81_v32, %v50_v31  ;;  %v49_v43 = vld [vmem:[%s1827_s1 + $0xd0] sm:$0xff]  ;;  %v67_v47 = vld [vmem:[%s1827_s1 + $0x160] sm:$0x3]  ;;  %v52_v49 = vld [vmem:[%s1827_s1 + $0xe8] sm:$0xff]  ;;  %v1446_v51 = vpack.c.bf16 %v64_v42, %v33_v41  ;;  %v150_v53 = vcombine.high %v148_v45, %v148_v45  ;;  %vm1557_vm2 = vmmov 0   ;;  %p1532_p0 = scmp.ne.s32.totalorder %s1403_s18, %s1531_s19  ;;  %p1537_p2 = scmp.lt.s32.totalorder %s1531_s19, %s1531_s19 }
  0x1f   :  { %1471 = vmatpush1.bf16.xpose.msra.mxu0 %v1470_v15  ;;  %1108 = vmatprep.mubr.f32.mxu0 %v201_v18  ;;  %v83_v50 = vld [vmem:[%s1827_s1 + $0x1e0] sm:$0x3]  ;;  %v1478_v52 = vpack.c.bf16 %v80_v44, %v49_v43  ;;  %v1448_v54 = vpack.c.bf16 %v67_v47, %v36_v46  ;;  %v218_v55 = vcombine.high %v216_v48, %v216_v48  ;;  %v18_v57 = vld [vmem:[%s1826_s0 + $0x18] sm:$0xff]  ;;  %v69_v1 = vld [vmem:[%s1827_s1 + $0x170] sm:$0x3]  ;;  %vm1394_vm3 = vcmask 74752  }
  0x20   :  { %1473 = vmatprep.subr.bf16.mxu0 %v1472_v19  ;;  %v1480_v56 = vpack.c.bf16 %v83_v50, %v52_v49  ;;  %v22_v58 = vld [vmem:[%s1826_s0 + $0x38] sm:$0x3f]  ;;  %v35_v59 = vld [vmem:[%s1827_s1 + $0x60] sm:$0xff]  ;;  %v158_v63 = vrot.slane %v18_v57, %v1619_v25  ;;  %v151_v7 = vcombine.high %v18_v57, %v18_v57  ;;  %v37_v9 = vld [vmem:[%s1827_s1 + $0x70] sm:$0xff]  ;;  %v1558_v19 = vmov 0.0   ;;  %p1538_p3 = por %p1537_p2, %p1536_p1 }
  0x21   :  { %v66_v60 = vld [vmem:[%s1827_s1 + $0x158] sm:$0x3]  ;;  %v51_v61 = vld [vmem:[%s1827_s1 + $0xe0] sm:$0xff]  ;;  %v226_v2 = vrot.slane %v22_v58, %v1619_v25  ;;  %v68_v10 = vld [vmem:[%s1827_s1 + $0x168] sm:$0x3]  ;;  %v219_v18 = vcombine.high %v22_v58, %v22_v58 }
  0x22   :  { %v82_v62 = vld [vmem:[%s1827_s1 + $0x1d8] sm:$0x3]  ;;  %v1450_v3 = vpack.c.bf16 %v66_v60, %v35_v59  ;;  %v166_v5 = vcombine.high %v158_v63, %v158_v63  ;;  %v84_v12 = vld [vmem:[%s1827_s1 + $0x1e8] sm:$0x3]  ;;  %v165_v13 = vrot.slane %v151_v7, %v1619_v25  ;;  %v1454_v15 = vpack.c.bf16 %v68_v10, %v37_v9  ;;  %vm1486_vm1 = vmpackc.low %vm265_vm0, %vm265_vm0  ;;  %p1539_p4 = pnand %p1538_p3, %p1532_p0 }
  0x23   :  { %v38_v0 = vld [vmem:[%s1827_s1 + $0x78] sm:$0xff]  ;;  %v1482_v4 = vpack.c.bf16 %v82_v62, %v51_v61  ;;  %v233_v20 = vrot.slane %v219_v18, %v1619_v25  ;;  %v1410_v21 = vld [vmem:[%s1828_s2] ss:$0 sm:$0xff] }
  0x24   :  { %549 = vmatmul.mubr.f32.vlgmr.msra.gmra.mrb[0].mxu1 %v131_v8  ;;  %v1452_v6 = vpack.c.bf16 %v69_v1, %v38_v0  ;;  %v234_v8 = vcombine.high %v226_v2, %v226_v2  ;;  %v167_v17 = vcombine.high %v165_v13, %v165_v13 }
  0x25   :  { %1443 = vmatpush1.bf16.xpose.msra.mxu1 %v1442_v33  ;;  %618 = vmatprep.mubr.f32.mxu1 %v149_v35 }
  0x26   :  { %1109 = vmatmul.mubr.f32.vlgmr.msra.gmra.mrb[0].mxu0 %v199_v11  ;;  %1445 = vmatprep.subr.bf16.mxu1 %v1444_v36  ;;  %v53_v11 = vld [vmem:[%s1827_s1 + $0xf0] sm:$0xff] }
  0x27   :  { %1475 = vmatpush1.bf16.xpose.msra.mxu0 %v1474_v34  ;;  %1178 = vmatprep.mubr.f32.mxu0 %v217_v38  ;;  %v1485_v16 = vpack.c.bf16 %v84_v12, %v53_v11 }
  0x28   :  { %1477 = vmatprep.subr.bf16.mxu0 %v1476_v39 }
  0x2c   :  { %619 = vmatmul.mubr.f32.vlgmr.msra.gmra.mrb[0].mxu1 %v141_v27 }
  0x2d   :  { %1447 = vmatpush1.bf16.xpose.msra.mxu1 %v1446_v51  ;;  %688 = vmatprep.mubr.f32.mxu1 %v150_v53 }
  0x2e   :  { %1179 = vmatmul.mubr.f32.vlgmr.msra.gmra.mrb[0].mxu0 %v209_v30  ;;  %1449 = vmatprep.subr.bf16.mxu1 %v1448_v54 }
  0x2f   :  { %1479 = vmatpush1.bf16.xpose.msra.mxu0 %v1478_v52  ;;  %1248 = vmatprep.mubr.f32.mxu0 %v218_v55 }
  0x30   :  { %1481 = vmatprep.subr.bf16.mxu0 %v1480_v56 }
  0x34   :  { %689 = vmatmul.mubr.f32.vlgmr.msra.gmra.mrb[0].mxu1 %v148_v45 }
  0x35   :  { %1451 = vmatpush1.bf16.xpose.msra.mxu1 %v1450_v3  ;;  %758 = vmatprep.mubr.f32.mxu1 %v166_v5 }
  0x36   :  { %1249 = vmatmul.mubr.f32.vlgmr.msra.gmra.mrb[0].mxu0 %v216_v48  ;;  %1453 = vmatprep.subr.bf16.mxu1 %v1452_v6 }
  0x37   :  { %1483 = vmatpush1.bf16.xpose.msra.mxu0 %v1482_v4  ;;  %1318 = vmatprep.mubr.f32.mxu0 %v234_v8 }
  0x38   :  { %1484 = vmatprep.subr.bf16.mxu0 %v1556_v14 }
  0x3c   :  { %759 = vmatmul.mubr.f32.vlgmr.msra.gmra.mrb[0].mxu1 %v158_v63 }
  0x3d   :  { %1455 = vmatpush1.bf16.xpose.msra.mxu1 %v1454_v15  ;;  %828 = vmatprep.mubr.f32.mxu1 %v167_v17 }
  0x3e   :  { %1319 = vmatmul.mubr.f32.vlgmr.msra.gmra.mrb[0].mxu0 %v226_v2 }
  0x3f   :  { %1487 = vmatpush3.bf16.xpose.msk.msra.mxu0 %vm1486_vm1, %v1485_v16  ;;  %1421 = vmatprep.mubr.msk.f32.mxu0 %vm1557_vm2, %v1558_v19 }
  0x44   :  { %829 = vmatmul.mubr.f32.vlgmr.msra.gmra.mrb[0].mxu1 %v165_v13 }
  0x46   :  { %1422 = vmatmul.mubr.msk.f32.vlgmr.msra.gmra.mrb[0].mxu0 %vm265_vm0, %v233_v20 }
 0x117   :  { %v830_v22 = vpop.f32.mrb[0].mxu1 }
 0x118   :  { %v1488_v24 = vadd.f32 %v1410_v21, %v830_v22  ;;  %v832_v26 = vpop.f32.mrb[1].mxu1 }
 0x119   :  { %v1390_v23 = vpop.f32.mrb[0].mxu0 }
 0x11a   :  { %v1423_v27 = vpop.f32.mrb[1].mxu0  ;;  %v1489_v28 = vadd.f32 %v1488_v24, %v1390_v23 }
 0x11c   :  { %1395 = vst.msk [vmem:[#allocation2] sm:$0x3] %vm1394_vm3, %v1489_v28 }
 0x11d   :  { %1542 = shalt.err (!%p1539_p4)
}
 0x11e   :  { %s1543_s21 = scalar_lea.hbm %s1829_s3, 32 }
 0x11f   :  { %p1544_p5 = scmp.ne.s32.totalorder %s1829_s3, %s1543_s21  ;;  %p1547_p6 = scmp.lt.u32.totalorder %s1543_s21, %s1829_s3 }
 0x121   :  { %p1549_p7 = pnand %p1547_p6, %p1544_p5 }
 0x123   :  { %1552 = shalt.err (!%p1549_p7)
}
 0x124   :  { %1405 = dma.vmem_to_hbm [thread:$0]  %s1403_s18, 32, %s1829_s3, [#allocation3]  }
 0x125   :  { %1553 = dma.done.wait [#allocation3], 32  }
 0x126   :  { %1554 = vsyncadd [#allocation3], 4294967264 }
 0x127   :  { %1409 = vsyncpa [#allocation3], 1 }

</bundles_post_ra>
